<compile_context>
chip_gen: v5e
topology: v5e:2x2
jax: 0.10.0
libtpu: 0.0.40
codegen_flags: <defaults>
</compile_context>

<pallas_src>
import jax
import jax.numpy as jnp
from jax.experimental import pallas as pl
from jax.experimental.pallas import tpu as pltpu


def _round_up(x, m):
    return ((x + m - 1) // m) * m


def sender_kernel(x_ref, wv_ref, bv_ref, wfc_ref, bfc_ref, o_ref, acc_ref):
    k = pl.program_id(1)

    @pl.when(k == 0)
    def _():
        acc_ref[...] = jnp.zeros_like(acc_ref)

    # Frozen backbone GEMM, K-tiled: acc += x_k @ Wv_k.
    # x arrives f32; cast to bf16 on the VPU (free filler under the MXU),
    # accumulate in f32.
    acc_ref[...] += jnp.dot(x_ref[...].astype(jnp.bfloat16), wv_ref[...],
                            preferred_element_type=jnp.float32)

    # Epilogue only once, at the final K step (bias broadcasts stay out of the
    # reduction loop): h = relu(acc + bv); out = h @ Wfc + bfc.
    @pl.when(k == pl.num_programs(1) - 1)
    def _():
        h = jnp.maximum(acc_ref[...] + bv_ref[...], 0.0)
        out = jnp.dot(h.astype(jnp.bfloat16), wfc_ref[...],
                      preferred_element_type=jnp.float32)
        o_ref[...] = (out + bfc_ref[...]).astype(o_ref.dtype)


def prepare_sender_params(wv, bv, wfc, bfc, *, tk_max=1024):
    """One-time pad + bf16 cast of the (frozen) parameters.

    wv: [in_feats, 500], bv: [500], wfc: [500, out], bfc: [out]
    Zero padding is numerically exact (padded rows/cols contribute 0).
    """
    in_feats, hidden = wv.shape
    out_size = wfc.shape[1]

    h_pad = _round_up(hidden, 256)                       # 500 -> 512
    n_pad = 128 if out_size <= 128 else _round_up(out_size, 256)
    tk = min(_round_up(in_feats, 256), tk_max)           # K tile, MXU-aligned
    k_pad = _round_up(in_feats, tk)

    wv_p = jnp.zeros((k_pad, h_pad), jnp.bfloat16).at[:in_feats, :hidden].set(
        wv.astype(jnp.bfloat16))
    bv_p = jnp.zeros((1, h_pad), jnp.float32).at[:, :hidden].set(
        bv.reshape(1, -1).astype(jnp.float32))
    wfc_p = jnp.zeros((h_pad, n_pad), jnp.bfloat16).at[:hidden, :out_size].set(
        wfc.astype(jnp.bfloat16))
    bfc_p = jnp.zeros((1, n_pad), jnp.float32).at[:, :out_size].set(
        bfc.reshape(1, -1).astype(jnp.float32))

    return dict(wv=wv_p, bv=bv_p, wfc=wfc_p, bfc=bfc_p,
                in_feats=in_feats, hidden=hidden, out_size=out_size, tk=tk)


def make_sender(wv, bv, wfc, bfc, *, block_b=256, tk_max=1024):
    """Returns forward(x_nchw) -> [B, out_size] float32.

    Weight prep happens exactly once here (not in the per-call path)."""
    pp = prepare_sender_params(wv, bv, wfc, bfc, tk_max=tk_max)
    wv_p, bv_p, wfc_p, bfc_p = pp["wv"], pp["bv"], pp["wfc"], pp["bfc"]
    in_feats, out_size, tk = pp["in_feats"], pp["out_size"], pp["tk"]

    @jax.jit
    def _forward(x_nchw, wv_p, bv_p, wfc_p, bfc_p):
        B = x_nchw.shape[0]
        x_flat = x_nchw.reshape(B, -1).astype(jnp.float32)
        if x_flat.shape[1] != in_feats:
            raise ValueError("flattened input feature size mismatch")

        k_pad, h_pad = wv_p.shape
        n_pad = wfc_p.shape[1]
        nk = k_pad // tk

        # Balanced batch tiles; bm >= 16 (bf16 sublane pack); >=2 tiles when
        # there is enough batch so the parallel axis can span both v7x cores.
        nb_target = max(1, pl.cdiv(B, block_b))
        if nb_target == 1 and B >= 32:
            nb_target = 2
        bm = _round_up(pl.cdiv(B, nb_target), 16)
        nb = pl.cdiv(B, bm)
        b_pad = nb * bm

        # x stays f32: only zero-pad batch / K here (cast happens in-kernel).
        if b_pad != B or k_pad != in_feats:
            x_p = jnp.zeros((b_pad, k_pad), jnp.float32).at[:B, :in_feats].set(
                x_flat)
        else:
            x_p = x_flat

        bytes_accessed = (x_p.size * 4 + wv_p.size * 2 + wfc_p.size * 2
                          + bv_p.size * 4 + bfc_p.size * 4 + b_pad * n_pad * 4)
        flops = 2 * b_pad * (k_pad * h_pad + h_pad * n_pad)

        out_padded = pl.pallas_call(
            sender_kernel,
            out_shape=jax.ShapeDtypeStruct((b_pad, n_pad), jnp.float32),
            grid=(nb, nk),                       # reduction (K) axis last
            in_specs=[
                pl.BlockSpec((bm, tk), lambda i, k: (i, k)),        # x streams
                pl.BlockSpec((tk, h_pad), lambda i, k: (k, 0)),     # Wv streams over K
                pl.BlockSpec((1, h_pad), lambda i, k: (0, 0)),      # bv resident
                pl.BlockSpec((h_pad, n_pad), lambda i, k: (0, 0)),  # Wfc resident
                pl.BlockSpec((1, n_pad), lambda i, k: (0, 0)),      # bfc resident
            ],
            out_specs=pl.BlockSpec((bm, n_pad), lambda i, k: (i, 0)),
            scratch_shapes=[pltpu.VMEM((bm, h_pad), jnp.float32)],  # f32 accumulator
            compiler_params=pltpu.CompilerParams(
                dimension_semantics=("parallel", "arbitrary"),
                vmem_limit_bytes=32 * 1024 * 1024),
            cost_estimate=pl.CostEstimate(
                flops=flops, transcendentals=0, bytes_accessed=bytes_accessed),
        )(x_p, wv_p, bv_p, wfc_p, bfc_p)

        # Strip batch / lane padding outside the kernel.
        return out_padded[:B, :out_size]

    def forward(x_nchw):
        return _forward(x_nchw, wv_p, bv_p, wfc_p, bfc_p)

    return forward


def reference_forward(x_nchw, wv, bv, wfc, bfc):
    B = x_nchw.shape[0]
    x_flat = x_nchw.reshape(B, -1)
    h = jnp.maximum(x_flat @ wv + bv.reshape(1, -1), 0.0)
    return h @ wfc + bfc.reshape(1, -1)


if __name__ == "__main__":
    # Small shapes consistent with the module: fc input dim is fixed at 500.
    B, C, H, W = 2, 4, 16, 16          # x: [2, 4, 16, 16] -> 1024 flat feats
    VISION_OUT = 500                   # dictated by nn.Linear(500, output_size)
    OUTPUT_SIZE = 32

    key = jax.random.PRNGKey(0)
    kx, kwv, kbv, kwfc, kbfc = jax.random.split(key, 5)

    x = jax.random.normal(kx, (B, C, H, W), dtype=jnp.float32)

    # Deterministic synthetic parameters (PyTorch Linear weight is [out, in];
    # we store the transposed [in, out] layout for row-major matmul).
    in_feats = C * H * W
    wv = jax.random.normal(kwv, (in_feats, VISION_OUT), dtype=jnp.float32) * 0.02
    bv = jax.random.normal(kbv, (1, VISION_OUT), dtype=jnp.float32) * 0.02
    wfc = jax.random.normal(kwfc, (VISION_OUT, OUTPUT_SIZE), dtype=jnp.float32) * 0.02
    bfc = jax.random.normal(kbfc, (1, OUTPUT_SIZE), dtype=jnp.float32) * 0.02

    sender = make_sender(wv, bv, wfc, bfc)      # weight pad/cast happens once
    out = sender(x)
    out = jax.block_until_ready(out)

    ref = reference_forward(x, wv, bv, wfc, bfc)
    assert out.shape == (B, OUTPUT_SIZE), out.shape
    # bf16 MXU inputs -> loosen tolerance vs. the pure-f32 reference.
    assert jnp.allclose(out, ref, atol=2e-2, rtol=2e-2), "mismatch vs reference"

    print("KERNEL_OK")
</pallas_src>

<mosaic_0001>
module attributes {stable_mosaic.version = 11 : i64} {
  func.func @sender_kernel(%arg0: i32, %arg1: i32, %arg2: memref<16x1024xf32, #tpu.memory_space<vmem>>, %arg3: memref<1024x512xbf16, #tpu.memory_space<vmem>>, %arg4: memref<1x512xf32, #tpu.memory_space<vmem>>, %arg5: memref<512x128xbf16, #tpu.memory_space<vmem>>, %arg6: memref<1x128xf32, #tpu.memory_space<vmem>>, %arg7: memref<16x128xf32, #tpu.memory_space<vmem>>, %arg8: memref<16x512xf32, #tpu.memory_space<vmem>>) attributes {dimension_semantics = [#tpu.dimension_semantics<parallel>, #tpu.dimension_semantics<arbitrary>], iteration_bounds = array<i64: 1, 1>, scalar_prefetch = 0 : i64, scratch_operands = 1 : i64, tpu.core_type = #tpu.core_type<tc>, window_params = [{transform_indices = @transform_0, window_bounds = array<i64: 16, 1024>}, {transform_indices = @transform_1, window_bounds = array<i64: 1024, 512>}, {pipeline_mode = #tpu.pipeline_mode<synchronous>, transform_indices = @transform_2, window_bounds = array<i64: 1, 512>}, {pipeline_mode = #tpu.pipeline_mode<synchronous>, transform_indices = @transform_3, window_bounds = array<i64: 512, 128>}, {pipeline_mode = #tpu.pipeline_mode<synchronous>, transform_indices = @transform_4, window_bounds = array<i64: 1, 128>}, {transform_indices = @transform_5, window_bounds = array<i64: 16, 128>}]} {
    %c0_i32 = arith.constant 0 : i32
    %0 = arith.cmpi eq, %arg1, %c0_i32 : i32
    %1 = arith.extui %0 : i1 to i32
    %c0_i32_0 = arith.constant 0 : i32
    %2 = arith.cmpi ne, %1, %c0_i32_0 : i32
    scf.if %2 {
      %cst_10 = arith.constant 0.000000e+00 : f32
      %13 = vector.broadcast %cst_10 : f32 to vector<16x512xf32>
      %c0_11 = arith.constant 0 : index
      %c0_12 = arith.constant 0 : index
      %14 = vector.load %arg8[%c0_11, %c0_12] : memref<16x512xf32, #tpu.memory_space<vmem>>, vector<16x512xf32>
      tpu.vector_store %arg8[%c0_11, %c0_12], %13 {strides = array<i32>} : memref<16x512xf32, #tpu.memory_space<vmem>>, vector<16x512xf32>,
    } else {
    }
    %c0 = arith.constant 0 : index
    %c0_1 = arith.constant 0 : index
    %3 = vector.load %arg8[%c0, %c0_1] : memref<16x512xf32, #tpu.memory_space<vmem>>, vector<16x512xf32>
    %c0_2 = arith.constant 0 : index
    %c0_3 = arith.constant 0 : index
    %4 = vector.load %arg2[%c0_2, %c0_3] : memref<16x1024xf32, #tpu.memory_space<vmem>>, vector<16x1024xf32>
    %5 = arith.truncf %4 : vector<16x1024xf32> to vector<16x1024xbf16>
    %c0_4 = arith.constant 0 : index
    %c0_5 = arith.constant 0 : index
    %6 = vector.load %arg3[%c0_4, %c0_5] : memref<1024x512xbf16, #tpu.memory_space<vmem>>, vector<1024x512xbf16>
    %cst = arith.constant dense<0.000000e+00> : vector<16x512xf32>
    %7 = tpu.matmul %5, %6, %cst {dimension_numbers = #tpu.dot_dimension_numbers<[1], [0], [0], [1], [0, 0, 1, 1], [], []>} : vector<16x1024xbf16>, vector<1024x512xbf16>, vector<16x512xf32> -> vector<16x512xf32>
    %8 = arith.addf %3, %7 : vector<16x512xf32>
    %c0_6 = arith.constant 0 : index
    %c0_7 = arith.constant 0 : index
    %9 = vector.load %arg8[%c0_6, %c0_7] : memref<16x512xf32, #tpu.memory_space<vmem>>, vector<16x512xf32>
    tpu.vector_store %arg8[%c0_6, %c0_7], %8 {strides = array<i32>} : memref<16x512xf32, #tpu.memory_space<vmem>>, vector<16x512xf32>,
    %c0_i32_8 = arith.constant 0 : i32
    %10 = arith.cmpi eq, %arg1, %c0_i32_8 : i32
    %11 = arith.extui %10 : i1 to i32
    %c0_i32_9 = arith.constant 0 : i32
    %12 = arith.cmpi ne, %11, %c0_i32_9 : i32
    scf.if %12 {
      %c0_10 = arith.constant 0 : index
      %c0_11 = arith.constant 0 : index
      %13 = vector.load %arg8[%c0_10, %c0_11] : memref<16x512xf32, #tpu.memory_space<vmem>>, vector<16x512xf32>
      %c0_12 = arith.constant 0 : index
      %c0_13 = arith.constant 0 : index
      %14 = vector.load %arg4[%c0_12, %c0_13] : memref<1x512xf32, #tpu.memory_space<vmem>>, vector<1x512xf32>
      %15 = vector.broadcast %14 : vector<1x512xf32> to vector<16x512xf32>
      %16 = arith.addf %13, %15 : vector<16x512xf32>
      %cst_14 = arith.constant 0.000000e+00 : f32
      %17 = vector.broadcast %cst_14 : f32 to vector<16x512xf32>
      %18 = arith.maximumf %16, %17 : vector<16x512xf32>
      %19 = arith.truncf %18 : vector<16x512xf32> to vector<16x512xbf16>
      %c0_15 = arith.constant 0 : index
      %c0_16 = arith.constant 0 : index
      %20 = vector.load %arg5[%c0_15, %c0_16] : memref<512x128xbf16, #tpu.memory_space<vmem>>, vector<512x128xbf16>
      %cst_17 = arith.constant dense<0.000000e+00> : vector<16x128xf32>
      %21 = tpu.matmul %19, %20, %cst_17 {dimension_numbers = #tpu.dot_dimension_numbers<[1], [0], [0], [1], [0, 0, 1, 1], [], []>} : vector<16x512xbf16>, vector<512x128xbf16>, vector<16x128xf32> -> vector<16x128xf32>
      %c0_18 = arith.constant 0 : index
      %c0_19 = arith.constant 0 : index
      %22 = vector.load %arg6[%c0_18, %c0_19] : memref<1x128xf32, #tpu.memory_space<vmem>>, vector<1x128xf32>
      %23 = vector.broadcast %22 : vector<1x128xf32> to vector<16x128xf32>
      %24 = arith.addf %21, %23 : vector<16x128xf32>
      %c0_20 = arith.constant 0 : index
      %c0_21 = arith.constant 0 : index
      %25 = vector.load %arg7[%c0_20, %c0_21] : memref<16x128xf32, #tpu.memory_space<vmem>>, vector<16x128xf32>
      tpu.vector_store %arg7[%c0_20, %c0_21], %24 {strides = array<i32>} : memref<16x128xf32, #tpu.memory_space<vmem>>, vector<16x128xf32>,
    } else {
    }
    return
  }
  func.func @transform_0(%arg0: i32, %arg1: i32) -> (i32, i32) {
    %c0_i32 = arith.constant 0 : i32
    return %arg0, %arg1 : i32, i32
  }
  func.func @transform_1(%arg0: i32, %arg1: i32) -> (i32, i32) {
    %c0_i32 = arith.constant 0 : i32
    %c0_i32_0 = arith.constant 0 : i32
    return %arg1, %c0_i32 : i32, i32
  }
  func.func @transform_2(%arg0: i32, %arg1: i32) -> (i32, i32) {
    %c0_i32 = arith.constant 0 : i32
    %c0_i32_0 = arith.constant 0 : i32
    %c0_i32_1 = arith.constant 0 : i32
    return %c0_i32, %c0_i32_0 : i32, i32
  }
  func.func @transform_3(%arg0: i32, %arg1: i32) -> (i32, i32) {
    %c0_i32 = arith.constant 0 : i32
    %c0_i32_0 = arith.constant 0 : i32
    %c0_i32_1 = arith.constant 0 : i32
    return %c0_i32, %c0_i32_0 : i32, i32
  }
  func.func @transform_4(%arg0: i32, %arg1: i32) -> (i32, i32) {
    %c0_i32 = arith.constant 0 : i32
    %c0_i32_0 = arith.constant 0 : i32
    %c0_i32_1 = arith.constant 0 : i32
    return %c0_i32, %c0_i32_0 : i32, i32
  }
  func.func @transform_5(%arg0: i32, %arg1: i32) -> (i32, i32) {
    %c0_i32 = arith.constant 0 : i32
    %c0_i32_0 = arith.constant 0 : i32
    return %arg0, %c0_i32 : i32, i32
  }
}

</mosaic_0001>

<bundles_post_ra>
// kernel: _forward.1
= control target key start
LH: loop header
LB: loop body
LE: loop exit
PB: predicated region body
PF: predicated region fallthrough
CT: control target
= control target key end

     0   :  { %10 = vsyncpa [#allocation4], 0  ;;  %s3914_s21 = smov [#allocation3]   ;;  %s3915_s23 = smov 256   ;;  %s4208_s0 = inlined_call_operand.vmem [shape: f32[16,1024], index: 0, kind: input, shape index: {}]   ;;  %s4209_s1 = inlined_call_operand.hbm [shape: bf16[1024,512], index: 1, kind: input, shape index: {}]   ;;  %s4210_s2 = inlined_call_operand.vmem [shape: f32[1,512], index: 2, kind: input, shape index: {}]   ;;  %s4211_s3 = inlined_call_operand.vmem [shape: bf16[512,128], index: 3, kind: input, shape index: {}]   ;;  %s4212_s4 = inlined_call_operand.vmem [shape: f32[1,128], index: 4, kind: input, shape index: {}]   ;;  %s4213_s5 = inlined_call_operand.vmem [shape: f32[16,128], index: 5, kind: output, shape index: {}]  }
   0x1   :  { %s17_s20 = sshll.u32 %s4209_s1, 4  ;;  %s19_s22 = sshll.u32 %s3914_s21, 4  ;;  %s18_s20 = int_to_ptr.hbm [resolvable:$true] %s17_s20  ;;  %s20_s22 = int_to_ptr.vmem [resolvable:$true] %s19_s22 }
   0x2   :  { %s3916_s24 = smov 16  }
   0x3   :  { %25 = dma.hbm_to_vmem [thread:$0]  %s18_s20, 32768, %s20_s22, [#allocation4], %s3915_s23, %s3915_s23, %s3916_s24  }
   0x4   :  { %3912 = dma.done.wait [#allocation4], 32768  }
   0x5   :  { %3913 = vsyncadd [#allocation4], 4294934528  ;;  %v2558_v0 = vld [vmem:[#allocation3 + $0xe0] sm:$0xf]  ;;  %v3626_v1 = vld [vmem:[#allocation3 + $0xec] sm:$0xf0] }
   0x6   :  { %v2686_v2 = vld [vmem:[#allocation3 + $0x1e0] sm:$0xf]  ;;  %v2559_v3 = vor.u32 %v3626_v1, %v2558_v0  ;;  %v3658_v4 = vld [vmem:[#allocation3 + $0x1ec] sm:$0xf0] }
   0x7   :  { %v2814_v5 = vld [vmem:[#allocation3 + $0x2e0] sm:$0xf]  ;;  %v3690_v6 = vld [vmem:[#allocation3 + $0x2ec] sm:$0xf0]  ;;  %v2687_v7 = vor.u32 %v3658_v4, %v2686_v2 }
   0x8   :  { %v2815_v8 = vor.u32 %v3690_v6, %v2814_v5  ;;  %v2942_v9 = vld [vmem:[#allocation3 + $0x3e0] sm:$0xf]  ;;  %v3722_v10 = vld [vmem:[#allocation3 + $0x3ec] sm:$0xf0]  ;;  %1616 = vmatpush.bf16.msra.mxu0 %v2559_v3 }
   0x9   :  { %v2542_v11 = vld [vmem:[#allocation3 + $0xc0] sm:$0xf]  ;;  %v2943_v12 = vor.u32 %v3722_v10, %v2942_v9  ;;  %v3622_v13 = vld [vmem:[#allocation3 + $0xcc] sm:$0xf0]  ;;  %1630 = vmatpush.bf16.msra.mxu1 %v2687_v7 }
   0xa   :  { %v2670_v14 = vld [vmem:[#allocation3 + $0x1c0] sm:$0xf]  ;;  %v3654_v15 = vld [vmem:[#allocation3 + $0x1cc] sm:$0xf0]  ;;  %1644 = vmatpush.bf16.msra.mxu2 %v2815_v8  ;;  %v2543_v16 = vor.u32 %v3622_v13, %v2542_v11 }
   0xb   :  { %v2671_v17 = vor.u32 %v3654_v15, %v2670_v14  ;;  %v2798_v18 = vld [vmem:[#allocation3 + $0x2c0] sm:$0xf]  ;;  %v3686_v19 = vld [vmem:[#allocation3 + $0x2cc] sm:$0xf0]  ;;  %1658 = vmatpush.bf16.msra.mxu3 %v2943_v12 }
   0xc   :  { %v2926_v20 = vld [vmem:[#allocation3 + $0x3c0] sm:$0xf]  ;;  %v2799_v21 = vor.u32 %v3686_v19, %v2798_v18  ;;  %v3718_v22 = vld [vmem:[#allocation3 + $0x3cc] sm:$0xf0]  ;;  %1617 = vmatpush.bf16.msra.mxu0 %v2543_v16 }
   0xd   :  { %v2526_v23 = vld [vmem:[#allocation3 + $0xa0] sm:$0xf]  ;;  %v3618_v24 = vld [vmem:[#allocation3 + $0xac] sm:$0xf0]  ;;  %v2927_v25 = vor.u32 %v3718_v22, %v2926_v20  ;;  %1631 = vmatpush.bf16.msra.mxu1 %v2671_v17 }
   0xe   :  { %v2654_v26 = vld [vmem:[#allocation3 + $0x1a0] sm:$0xf]  ;;  %v3650_v27 = vld [vmem:[#allocation3 + $0x1ac] sm:$0xf0]  ;;  %v2527_v29 = vor.u32 %v3618_v24, %v2526_v23  ;;  %1645 = vmatpush.bf16.msra.mxu2 %v2799_v21 }
   0xf   :  { %v2782_v28 = vld [vmem:[#allocation3 + $0x2a0] sm:$0xf]  ;;  %v3682_v30 = vld [vmem:[#allocation3 + $0x2ac] sm:$0xf0]  ;;  %v2655_v33 = vor.u32 %v3650_v27, %v2654_v26  ;;  %1659 = vmatpush.bf16.msra.mxu3 %v2927_v25 }
  0x10   :  { %v2910_v31 = vld [vmem:[#allocation3 + $0x3a0] sm:$0xf]  ;;  %v3714_v32 = vld [vmem:[#allocation3 + $0x3ac] sm:$0xf0]  ;;  %v2783_v34 = vor.u32 %v3682_v30, %v2782_v28  ;;  %1618 = vmatpush.bf16.msra.mxu0 %v2527_v29 }
  0x11   :  { %v2510_v35 = vld [vmem:[#allocation3 + $0x80] sm:$0xf]  ;;  %v3614_v36 = vld [vmem:[#allocation3 + $0x8c] sm:$0xf0]  ;;  %v2911_v38 = vor.u32 %v3714_v32, %v2910_v31  ;;  %1632 = vmatpush.bf16.msra.mxu1 %v2655_v33 }
  0x12   :  { %v2638_v37 = vld [vmem:[#allocation3 + $0x180] sm:$0xf]  ;;  %v3646_v39 = vld [vmem:[#allocation3 + $0x18c] sm:$0xf0]  ;;  %v2511_v44 = vor.u32 %v3614_v36, %v2510_v35  ;;  %1646 = vmatpush.bf16.msra.mxu2 %v2783_v34 }
  0x13   :  { %v2766_v40 = vld [vmem:[#allocation3 + $0x280] sm:$0xf]  ;;  %v3678_v41 = vld [vmem:[#allocation3 + $0x28c] sm:$0xf0]  ;;  %v2639_v45 = vor.u32 %v3646_v39, %v2638_v37  ;;  %1660 = vmatpush.bf16.msra.mxu3 %v2911_v38 }
  0x14   :  { %v2894_v42 = vld [vmem:[#allocation3 + $0x380] sm:$0xf]  ;;  %v3710_v43 = vld [vmem:[#allocation3 + $0x38c] sm:$0xf0]  ;;  %v2767_v46 = vor.u32 %v3678_v41, %v2766_v40  ;;  %1619 = vmatpush.bf16.msra.mxu0 %v2511_v44 }
  0x15   :  { %v2494_v47 = vld [vmem:[#allocation3 + $0x60] sm:$0xf]  ;;  %v3610_v48 = vld [vmem:[#allocation3 + $0x6c] sm:$0xf0]  ;;  %v2895_v50 = vor.u32 %v3710_v43, %v2894_v42  ;;  %1633 = vmatpush.bf16.msra.mxu1 %v2639_v45 }
  0x16   :  { %v2622_v49 = vld [vmem:[#allocation3 + $0x160] sm:$0xf]  ;;  %v3642_v51 = vld [vmem:[#allocation3 + $0x16c] sm:$0xf0]  ;;  %v2495_v56 = vor.u32 %v3610_v48, %v2494_v47  ;;  %1647 = vmatpush.bf16.msra.mxu2 %v2767_v46 }
  0x17   :  { %v2750_v52 = vld [vmem:[#allocation3 + $0x260] sm:$0xf]  ;;  %v3674_v53 = vld [vmem:[#allocation3 + $0x26c] sm:$0xf0]  ;;  %v2623_v57 = vor.u32 %v3642_v51, %v2622_v49  ;;  %1661 = vmatpush.bf16.msra.mxu3 %v2895_v50 }
  0x18   :  { %v2878_v54 = vld [vmem:[#allocation3 + $0x360] sm:$0xf]  ;;  %v3706_v55 = vld [vmem:[#allocation3 + $0x36c] sm:$0xf0]  ;;  %v2751_v58 = vor.u32 %v3674_v53, %v2750_v52  ;;  %1620 = vmatpush.bf16.msra.mxu0 %v2495_v56 }
  0x19   :  { %v2478_v59 = vld [vmem:[#allocation3 + $0x40] sm:$0xf]  ;;  %v3606_v60 = vld [vmem:[#allocation3 + $0x4c] sm:$0xf0]  ;;  %v2879_v62 = vor.u32 %v3706_v55, %v2878_v54  ;;  %1634 = vmatpush.bf16.msra.mxu1 %v2623_v57 }
  0x1a   :  { %v2606_v61 = vld [vmem:[#allocation3 + $0x140] sm:$0xf]  ;;  %v3638_v63 = vld [vmem:[#allocation3 + $0x14c] sm:$0xf0]  ;;  %v2479_v4 = vor.u32 %v3606_v60, %v2478_v59  ;;  %1648 = vmatpush.bf16.msra.mxu2 %v2751_v58 }
  0x1b   :  { %v2734_v0 = vld [vmem:[#allocation3 + $0x240] sm:$0xf]  ;;  %v3670_v1 = vld [vmem:[#allocation3 + $0x24c] sm:$0xf0]  ;;  %v2607_v5 = vor.u32 %v3638_v63, %v2606_v61  ;;  %1662 = vmatpush.bf16.msra.mxu3 %v2879_v62 }
  0x1c   :  { %v2862_v2 = vld [vmem:[#allocation3 + $0x340] sm:$0xf]  ;;  %v3702_v3 = vld [vmem:[#allocation3 + $0x34c] sm:$0xf0]  ;;  %v2735_v6 = vor.u32 %v3670_v1, %v2734_v0  ;;  %1621 = vmatpush.bf16.msra.mxu0 %v2479_v4 }
  0x1d   :  { %v2462_v7 = vld [vmem:[#allocation3 + $0x20] sm:$0xf]  ;;  %v3602_v8 = vld [vmem:[#allocation3 + $0x2c] sm:$0xf0]  ;;  %v2863_v10 = vor.u32 %v3702_v3, %v2862_v2  ;;  %1635 = vmatpush.bf16.msra.mxu1 %v2607_v5 }
  0x1e   :  { %v2590_v9 = vld [vmem:[#allocation3 + $0x120] sm:$0xf]  ;;  %v3634_v11 = vld [vmem:[#allocation3 + $0x12c] sm:$0xf0]  ;;  %v2463_v16 = vor.u32 %v3602_v8, %v2462_v7  ;;  %1649 = vmatpush.bf16.msra.mxu2 %v2735_v6  ;;  %v57_v6 = vld [vmem:[%s4208_s0 + $0x8] sm:$0xff] }
  0x1f   :  { %v2718_v12 = vld [vmem:[#allocation3 + $0x220] sm:$0xf]  ;;  %v3666_v13 = vld [vmem:[#allocation3 + $0x22c] sm:$0xf0]  ;;  %v2591_v19 = vor.u32 %v3634_v11, %v2590_v9  ;;  %1663 = vmatpush.bf16.msra.mxu3 %v2863_v10  ;;  %v65_v7 = vld [vmem:[%s4208_s0 + $0x48] sm:$0xff] }
  0x20   :  { %v2846_v14 = vld [vmem:[#allocation3 + $0x320] sm:$0xf]  ;;  %v3698_v15 = vld [vmem:[#allocation3 + $0x32c] sm:$0xf0]  ;;  %v2719_v20 = vor.u32 %v3666_v13, %v2718_v12  ;;  %1622 = vmatpush.bf16.msra.mxu0 %v2463_v16  ;;  %v59_v8 = vld [vmem:[%s4208_s0 + $0x18] sm:$0xff]  ;;  %v3977_v10 = vpack.c.bf16 %v65_v7, %v57_v6 }
  0x21   :  { %v2446_v17 = vld [vmem:[#allocation3] sm:$0xf]  ;;  %v3598_v18 = vld [vmem:[#allocation3 + $0xc] sm:$0xf0]  ;;  %v2847_v24 = vor.u32 %v3698_v15, %v2846_v14  ;;  %1636 = vmatpush.bf16.msra.mxu1 %v2591_v19  ;;  %v67_v11 = vld [vmem:[%s4208_s0 + $0x58] sm:$0xff] }
  0x22   :  { %v2574_v21 = vld [vmem:[#allocation3 + $0x100] sm:$0xf]  ;;  %v3630_v22 = vld [vmem:[#allocation3 + $0x10c] sm:$0xf0]  ;;  %v2447_v31 = vor.u32 %v3598_v18, %v2446_v17  ;;  %1650 = vmatpush.bf16.msra.mxu2 %v2719_v20  ;;  %v3982_v17 = vpack.c.bf16 %v67_v11, %v59_v8 }
  0x23   :  { %v2702_v23 = vld [vmem:[#allocation3 + $0x200] sm:$0xf]  ;;  %v3662_v25 = vld [vmem:[#allocation3 + $0x20c] sm:$0xf0]  ;;  %v2575_v35 = vor.u32 %v3630_v22, %v2574_v21  ;;  %1664 = vmatpush.bf16.msra.mxu3 %v2847_v24 }
  0x24   :  { %v2830_v26 = vld [vmem:[#allocation3 + $0x300] sm:$0xf]  ;;  %v3694_v27 = vld [vmem:[#allocation3 + $0x30c] sm:$0xf0]  ;;  %v2703_v36 = vor.u32 %v3662_v25, %v2702_v23  ;;  %1623 = vmatpush.bf16.msra.mxu0 %v2447_v31 }
  0x25   :  { %v3070_v28 = vld [vmem:[#allocation3 + $0x4e0] sm:$0xf]  ;;  %v3754_v29 = vld [vmem:[#allocation3 + $0x4ec] sm:$0xf0]  ;;  %v2831_v39 = vor.u32 %v3694_v27, %v2830_v26  ;;  %1637 = vmatpush.bf16.msra.mxu1 %v2575_v35 }
  0x26   :  { %v3198_v30 = vld [vmem:[#allocation3 + $0x5e0] sm:$0xf]  ;;  %v3786_v32 = vld [vmem:[#allocation3 + $0x5ec] sm:$0xf0]  ;;  %v3071_v40 = vor.u32 %v3754_v29, %v3070_v28  ;;  %1651 = vmatpush.bf16.msra.mxu2 %v2703_v36 }
  0x27   :  { %v3326_v33 = vld [vmem:[#allocation3 + $0x6e0] sm:$0xf]  ;;  %v3818_v34 = vld [vmem:[#allocation3 + $0x6ec] sm:$0xf0]  ;;  %v3199_v43 = vor.u32 %v3786_v32, %v3198_v30  ;;  %1665 = vmatpush.bf16.msra.mxu3 %v2831_v39 }
  0x28   :  { %v3454_v37 = vld [vmem:[#allocation3 + $0x7e0] sm:$0xf]  ;;  %v3850_v38 = vld [vmem:[#allocation3 + $0x7ec] sm:$0xf0]  ;;  %v3327_v44 = vor.u32 %v3818_v34, %v3326_v33  ;;  %1672 = vmatpush.bf16.msrb.mxu0 %v3071_v40  ;;  %1638 = vmatmul.bf16.vlgmr.msra.gmra.mxu1 %v3977_v10 }
  0x29   :  { %v3054_v41 = vld [vmem:[#allocation3 + $0x4c0] sm:$0xf]  ;;  %v3750_v42 = vld [vmem:[#allocation3 + $0x4cc] sm:$0xf0]  ;;  %v3455_v48 = vor.u32 %v3850_v38, %v3454_v37  ;;  %1686 = vmatpush.bf16.msrb.mxu1 %v3199_v43 }
  0x2a   :  { %v3182_v45 = vld [vmem:[#allocation3 + $0x5c0] sm:$0xf]  ;;  %v3782_v46 = vld [vmem:[#allocation3 + $0x5cc] sm:$0xf0]  ;;  %v3055_v55 = vor.u32 %v3750_v42, %v3054_v41  ;;  %1700 = vmatpush.bf16.msrb.mxu2 %v3327_v44  ;;  %1666 = vmatmul.bf16.vlgmr.msra.gmra.mxu3 %v3982_v17 }
  0x2b   :  { %v3310_v47 = vld [vmem:[#allocation3 + $0x6c0] sm:$0xf]  ;;  %v3814_v49 = vld [vmem:[#allocation3 + $0x6cc] sm:$0xf0]  ;;  %v3183_v60 = vor.u32 %v3782_v46, %v3182_v45  ;;  %1714 = vmatpush.bf16.msrb.mxu3 %v3455_v48 }
  0x2c   :  { %v3438_v50 = vld [vmem:[#allocation3 + $0x7c0] sm:$0xf]  ;;  %v3846_v51 = vld [vmem:[#allocation3 + $0x7cc] sm:$0xf0]  ;;  %v3311_v61 = vor.u32 %v3814_v49, %v3310_v47  ;;  %1673 = vmatpush.bf16.msrb.mxu0 %v3055_v55 }
  0x2d   :  { %v56_v52 = vld [vmem:[%s4208_s0] sm:$0xff]  ;;  %v58_v54 = vld [vmem:[%s4208_s0 + $0x10] sm:$0xff]  ;;  %v3439_v2 = vor.u32 %v3846_v51, %v3438_v50  ;;  %1687 = vmatpush.bf16.msrb.mxu1 %v3183_v60 }
  0x2e   :  { %v64_v53 = vld [vmem:[%s4208_s0 + $0x40] sm:$0xff]  ;;  %v3746_v57 = vld [vmem:[#allocation3 + $0x4ac] sm:$0xf0]  ;;  %1701 = vmatpush.bf16.msrb.mxu2 %v3311_v61 }
  0x2f   :  { %v3038_v56 = vld [vmem:[#allocation3 + $0x4a0] sm:$0xf]  ;;  %v3959_v58 = vpack.c.bf16 %v64_v53, %v56_v52  ;;  %v66_v59 = vld [vmem:[%s4208_s0 + $0x50] sm:$0xff]  ;;  %1715 = vmatpush.bf16.msrb.mxu3 %v3439_v2 }
  0x30   :  { %v3166_v62 = vld [vmem:[#allocation3 + $0x5a0] sm:$0xf]  ;;  %v3778_v63 = vld [vmem:[#allocation3 + $0x5ac] sm:$0xf0]  ;;  %v3964_v1 = vpack.c.bf16 %v66_v59, %v58_v54  ;;  %v3039_v9 = vor.u32 %v3746_v57, %v3038_v56 }
  0x31   :  { %v3294_v0 = vld [vmem:[#allocation3 + $0x6a0] sm:$0xf]  ;;  %v3810_v3 = vld [vmem:[#allocation3 + $0x6ac] sm:$0xf0]  ;;  %1624 = vmatmul.bf16.vlgmr.msra.gmra.mxu0 %v3959_v58  ;;  %v3167_v12 = vor.u32 %v3778_v63, %v3166_v62 }
  0x32   :  { %v3422_v4 = vld [vmem:[#allocation3 + $0x7a0] sm:$0xf]  ;;  %v3842_v5 = vld [vmem:[#allocation3 + $0x7ac] sm:$0xf0]  ;;  %1652 = vmatmul.bf16.vlgmr.msra.gmra.mxu2 %v3964_v1  ;;  %v3295_v13 = vor.u32 %v3810_v3, %v3294_v0  ;;  %1674 = vmatpush.bf16.msrb.mxu0 %v3039_v9  ;;  %v3624_v9 = vld [vmem:[#allocation3 + $0xe4] sm:$0xf] }
  0x33   :  { %v3022_v14 = vld [vmem:[#allocation3 + $0x480] sm:$0xf]  ;;  %v3742_v15 = vld [vmem:[#allocation3 + $0x48c] sm:$0xf0]  ;;  %v3423_v18 = vor.u32 %v3842_v5, %v3422_v4  ;;  %1688 = vmatpush.bf16.msrb.mxu1 %v3167_v12  ;;  %v2560_v12 = vld [vmem:[#allocation3 + $0xf0] sm:$0xf0] }
  0x34   :  { %v3150_v16 = vld [vmem:[#allocation3 + $0x580] sm:$0xf]  ;;  %v3774_v19 = vld [vmem:[#allocation3 + $0x58c] sm:$0xf0]  ;;  %v3023_v24 = vor.u32 %v3742_v15, %v3022_v14  ;;  %1702 = vmatpush.bf16.msrb.mxu2 %v3295_v13  ;;  %v3656_v13 = vld [vmem:[#allocation3 + $0x1e4] sm:$0xf] }
  0x35   :  { %v3278_v20 = vld [vmem:[#allocation3 + $0x680] sm:$0xf]  ;;  %v3806_v21 = vld [vmem:[#allocation3 + $0x68c] sm:$0xf0]  ;;  %v3151_v25 = vor.u32 %v3774_v19, %v3150_v16  ;;  %1716 = vmatpush.bf16.msrb.mxu3 %v3423_v18  ;;  %v2688_v14 = vld [vmem:[#allocation3 + $0x1f0] sm:$0xf0] }
  0x36   :  { %v3406_v22 = vld [vmem:[#allocation3 + $0x780] sm:$0xf]  ;;  %v3838_v23 = vld [vmem:[#allocation3 + $0x78c] sm:$0xf0]  ;;  %v3279_v26 = vor.u32 %v3806_v21, %v3278_v20  ;;  %1675 = vmatpush.bf16.msrb.mxu0 %v3023_v24  ;;  %v3688_v15 = vld [vmem:[#allocation3 + $0x2e4] sm:$0xf] }
  0x37   :  { %v3006_v27 = vld [vmem:[#allocation3 + $0x460] sm:$0xf]  ;;  %v3738_v28 = vld [vmem:[#allocation3 + $0x46c] sm:$0xf0]  ;;  %v3407_v30 = vor.u32 %v3838_v23, %v3406_v22  ;;  %1689 = vmatpush.bf16.msrb.mxu1 %v3151_v25  ;;  %v2816_v16 = vld [vmem:[#allocation3 + $0x2f0] sm:$0xf0] }
  0x38   :  { %v3134_v29 = vld [vmem:[#allocation3 + $0x560] sm:$0xf]  ;;  %v3770_v31 = vld [vmem:[#allocation3 + $0x56c] sm:$0xf0]  ;;  %v3007_v36 = vor.u32 %v3738_v28, %v3006_v27  ;;  %1703 = vmatpush.bf16.msrb.mxu2 %v3279_v26  ;;  %v3720_v18 = vld [vmem:[#allocation3 + $0x3e4] sm:$0xf] }
  0x39   :  { %v3262_v32 = vld [vmem:[#allocation3 + $0x660] sm:$0xf]  ;;  %v3802_v33 = vld [vmem:[#allocation3 + $0x66c] sm:$0xf0]  ;;  %v3135_v37 = vor.u32 %v3770_v31, %v3134_v29  ;;  %1717 = vmatpush.bf16.msrb.mxu3 %v3407_v30  ;;  %v2944_v20 = vld [vmem:[#allocation3 + $0x3f0] sm:$0xf0]  ;;  %v2563_v29 = vor.u32 %v3624_v9, %v2560_v12 }
  0x3a   :  { %v3390_v34 = vld [vmem:[#allocation3 + $0x760] sm:$0xf]  ;;  %v3834_v35 = vld [vmem:[#allocation3 + $0x76c] sm:$0xf0]  ;;  %v3263_v38 = vor.u32 %v3802_v33, %v3262_v32  ;;  %1676 = vmatpush.bf16.msrb.mxu0 %v3007_v36  ;;  %v61_v27 = vld [vmem:[%s4208_s0 + $0x28] sm:$0xff]  ;;  %v2691_v33 = vor.u32 %v3656_v13, %v2688_v14 }
  0x3b   :  { %v2990_v39 = vld [vmem:[#allocation3 + $0x440] sm:$0xf]  ;;  %v3734_v40 = vld [vmem:[#allocation3 + $0x44c] sm:$0xf0]  ;;  %v3391_v42 = vor.u32 %v3834_v35, %v3390_v34  ;;  %1690 = vmatpush.bf16.msrb.mxu1 %v3135_v37  ;;  %v69_v30 = vld [vmem:[%s4208_s0 + $0x68] sm:$0xff]  ;;  %v2819_v34 = vor.u32 %v3688_v15, %v2816_v16 }
  0x3c   :  { %v3118_v41 = vld [vmem:[#allocation3 + $0x540] sm:$0xf]  ;;  %v3766_v43 = vld [vmem:[#allocation3 + $0x54c] sm:$0xf0]  ;;  %v2991_v48 = vor.u32 %v3734_v40, %v2990_v39  ;;  %1704 = vmatpush.bf16.msrb.mxu2 %v3263_v38  ;;  %v63_v31 = vld [vmem:[%s4208_s0 + $0x38] sm:$0xff]  ;;  %v2947_v38 = vor.u32 %v3720_v18, %v2944_v20 }
  0x3d   :  { %v3246_v44 = vld [vmem:[#allocation3 + $0x640] sm:$0xf]  ;;  %v3798_v45 = vld [vmem:[#allocation3 + $0x64c] sm:$0xf0]  ;;  %v3119_v50 = vor.u32 %v3766_v43, %v3118_v41  ;;  %1718 = vmatpush.bf16.msrb.mxu3 %v3391_v42  ;;  %v71_v32 = vld [vmem:[%s4208_s0 + $0x78] sm:$0xff] }
  0x3e   :  { %v3374_v46 = vld [vmem:[#allocation3 + $0x740] sm:$0xf]  ;;  %v3830_v47 = vld [vmem:[#allocation3 + $0x74c] sm:$0xf0]  ;;  %v3247_v51 = vor.u32 %v3798_v45, %v3246_v44  ;;  %1677 = vmatpush.bf16.msrb.mxu0 %v2991_v48  ;;  %v3620_v35 = vld [vmem:[#allocation3 + $0xc4] sm:$0xf]  ;;  %v4014_v44 = vpack.c.bf16 %v69_v30, %v61_v27 }
  0x3f   :  { %v2974_v49 = vld [vmem:[#allocation3 + $0x420] sm:$0xf]  ;;  %v3730_v52 = vld [vmem:[#allocation3 + $0x42c] sm:$0xf0]  ;;  %v3375_v55 = vor.u32 %v3830_v47, %v3374_v46  ;;  %1691 = vmatpush.bf16.msrb.mxu1 %v3119_v50  ;;  %v2544_v36 = vld [vmem:[#allocation3 + $0xd0] sm:$0xf0]  ;;  %v4016_v47 = vpack.c.bf16 %v71_v32, %v63_v31 }
  0x40   :  { %v3102_v53 = vld [vmem:[#allocation3 + $0x520] sm:$0xf]  ;;  %v3762_v54 = vld [vmem:[#allocation3 + $0x52c] sm:$0xf0]  ;;  %v2975_v63 = vor.u32 %v3730_v52, %v2974_v49  ;;  %1705 = vmatpush.bf16.msrb.mxu2 %v3247_v51  ;;  %v3652_v37 = vld [vmem:[#allocation3 + $0x1c4] sm:$0xf]  ;;  %v2547_v48 = vor.u32 %v3620_v35, %v2544_v36 }
  0x41   :  { %v3230_v56 = vld [vmem:[#allocation3 + $0x620] sm:$0xf]  ;;  %v3794_v57 = vld [vmem:[#allocation3 + $0x62c] sm:$0xf0]  ;;  %v3103_v5 = vor.u32 %v3762_v54, %v3102_v53  ;;  %1719 = vmatpush.bf16.msrb.mxu3 %v3375_v55  ;;  %v2672_v40 = vld [vmem:[#allocation3 + $0x1d0] sm:$0xf0] }
  0x42   :  { %v3358_v59 = vld [vmem:[#allocation3 + $0x720] sm:$0xf]  ;;  %v3826_v60 = vld [vmem:[#allocation3 + $0x72c] sm:$0xf0]  ;;  %v3231_v6 = vor.u32 %v3794_v57, %v3230_v56  ;;  %1678 = vmatpush.bf16.msrb.mxu0 %v2975_v63  ;;  %v3684_v41 = vld [vmem:[#allocation3 + $0x2c4] sm:$0xf]  ;;  %v2675_v49 = vor.u32 %v3652_v37, %v2672_v40 }
  0x43   :  { %v2958_v61 = vld [vmem:[#allocation3 + $0x400] sm:$0xf]  ;;  %v3726_v62 = vld [vmem:[#allocation3 + $0x40c] sm:$0xf0]  ;;  %v3359_v11 = vor.u32 %v3826_v60, %v3358_v59  ;;  %1692 = vmatpush.bf16.msrb.mxu1 %v3103_v5  ;;  %v2800_v42 = vld [vmem:[#allocation3 + $0x2d0] sm:$0xf0] }
  0x44   :  { %v3086_v0 = vld [vmem:[#allocation3 + $0x500] sm:$0xf]  ;;  %v3758_v2 = vld [vmem:[#allocation3 + $0x50c] sm:$0xf0]  ;;  %v2959_v19 = vor.u32 %v3726_v62, %v2958_v61  ;;  %1706 = vmatpush.bf16.msrb.mxu2 %v3231_v6  ;;  %v3716_v45 = vld [vmem:[#allocation3 + $0x3c4] sm:$0xf]  ;;  %v2803_v50 = vor.u32 %v3684_v41, %v2800_v42 }
  0x45   :  { %v3214_v3 = vld [vmem:[#allocation3 + $0x600] sm:$0xf]  ;;  %v3790_v4 = vld [vmem:[#allocation3 + $0x60c] sm:$0xf0]  ;;  %v3087_v23 = vor.u32 %v3758_v2, %v3086_v0  ;;  %1720 = vmatpush.bf16.msrb.mxu3 %v3359_v11  ;;  %v2928_v46 = vld [vmem:[#allocation3 + $0x3d0] sm:$0xf0] }
  0x46   :  { %v3342_v7 = vld [vmem:[#allocation3 + $0x700] sm:$0xf]  ;;  %v3822_v8 = vld [vmem:[#allocation3 + $0x70c] sm:$0xf0]  ;;  %v3215_v24 = vor.u32 %v3790_v4, %v3214_v3  ;;  %1679 = vmatpush.bf16.msrb.mxu0 %v2959_v19  ;;  %v3616_v51 = vld [vmem:[#allocation3 + $0xa4] sm:$0xf]  ;;  %v2931_v54 = vor.u32 %v3716_v45, %v2928_v46 }
  0x47   :  { %v60_v21 = vld [vmem:[%s4208_s0 + $0x20] sm:$0xff]  ;;  %v62_v25 = vld [vmem:[%s4208_s0 + $0x30] sm:$0xff]  ;;  %v3343_v28 = vor.u32 %v3822_v8, %v3342_v7  ;;  %1693 = vmatpush.bf16.msrb.mxu1 %v3087_v23 }
  0x48   :  { %v68_v22 = vld [vmem:[%s4208_s0 + $0x60] sm:$0xff]  ;;  %v70_v26 = vld [vmem:[%s4208_s0 + $0x70] sm:$0xff]  ;;  %1707 = vmatpush.bf16.msrb.mxu2 %v3215_v24 }
  0x49   :  { %v4010_v39 = vpack.c.bf16 %v68_v22, %v60_v21  ;;  %v4012_v43 = vpack.c.bf16 %v70_v26, %v62_v25  ;;  %1721 = vmatpush.bf16.msrb.mxu3 %v3343_v28  ;;  %v2528_v52 = vld [vmem:[#allocation3 + $0xb0] sm:$0xf0]  ;;  %v3648_v53 = vld [vmem:[#allocation3 + $0x1a4] sm:$0xf] }
  0x4a   :  { %1728 = vmatpush.bf16.msra.mxu0 %v2563_v29  ;;  %v2656_v55 = vld [vmem:[#allocation3 + $0x1b0] sm:$0xf0]  ;;  %v3680_v56 = vld [vmem:[#allocation3 + $0x2a4] sm:$0xf]  ;;  %1694 = vmatmul.bf16.vlgmr.msrb.gmra.mxu1 %v4014_v44  ;;  %v2531_v61 = vor.u32 %v3616_v51, %v2528_v52 }
  0x4b   :  { %1742 = vmatpush.bf16.msra.mxu1 %v2691_v33  ;;  %1680 = vmatmul.bf16.vlgmr.msrb.gmra.mxu0 %v4010_v39  ;;  %v2784_v57 = vld [vmem:[#allocation3 + $0x2b0] sm:$0xf0]  ;;  %v3712_v59 = vld [vmem:[#allocation3 + $0x3a4] sm:$0xf]  ;;  %v2659_v62 = vor.u32 %v3648_v53, %v2656_v55 }
  0x4c   :  { %1756 = vmatpush.bf16.msra.mxu2 %v2819_v34  ;;  %v2912_v60 = vld [vmem:[#allocation3 + $0x3b0] sm:$0xf0]  ;;  %1722 = vmatmul.bf16.vlgmr.msrb.gmra.mxu3 %v4016_v47  ;;  %v2787_v63 = vor.u32 %v3680_v56, %v2784_v57  ;;  %v3612_v0 = vld [vmem:[#allocation3 + $0x84] sm:$0xf] }
  0x4d   :  { %1770 = vmatpush.bf16.msra.mxu3 %v2947_v38  ;;  %1708 = vmatmul.bf16.vlgmr.msrb.gmra.mxu2 %v4012_v43  ;;  %v2512_v2 = vld [vmem:[#allocation3 + $0x90] sm:$0xf0]  ;;  %v3644_v3 = vld [vmem:[#allocation3 + $0x184] sm:$0xf]  ;;  %v2915_v4 = vor.u32 %v3712_v59, %v2912_v60 }
  0x4e   :  { %1729 = vmatpush.bf16.msra.mxu0 %v2547_v48  ;;  %v2640_v5 = vld [vmem:[#allocation3 + $0x190] sm:$0xf0]  ;;  %v3676_v6 = vld [vmem:[#allocation3 + $0x284] sm:$0xf]  ;;  %v2515_v11 = vor.u32 %v3612_v0, %v2512_v2 }
  0x4f   :  { %1743 = vmatpush.bf16.msra.mxu1 %v2675_v49  ;;  %v2768_v7 = vld [vmem:[#allocation3 + $0x290] sm:$0xf0]  ;;  %v3708_v8 = vld [vmem:[#allocation3 + $0x384] sm:$0xf]  ;;  %v2643_v12 = vor.u32 %v3644_v3, %v2640_v5 }
  0x50   :  { %1757 = vmatpush.bf16.msra.mxu2 %v2803_v50  ;;  %v2896_v9 = vld [vmem:[#allocation3 + $0x390] sm:$0xf0]  ;;  %v2771_v13 = vor.u32 %v3676_v6, %v2768_v7  ;;  %v3608_v14 = vld [vmem:[#allocation3 + $0x64] sm:$0xf] }
  0x51   :  { %1771 = vmatpush.bf16.msra.mxu3 %v2931_v54  ;;  %v2496_v15 = vld [vmem:[#allocation3 + $0x70] sm:$0xf0]  ;;  %v3640_v16 = vld [vmem:[#allocation3 + $0x164] sm:$0xf]  ;;  %v2899_v18 = vor.u32 %v3708_v8, %v2896_v9 }
  0x52   :  { %1730 = vmatpush.bf16.msra.mxu0 %v2531_v61  ;;  %v2624_v19 = vld [vmem:[#allocation3 + $0x170] sm:$0xf0]  ;;  %v3672_v20 = vld [vmem:[#allocation3 + $0x264] sm:$0xf]  ;;  %v2499_v24 = vor.u32 %v3608_v14, %v2496_v15 }
  0x53   :  { %1744 = vmatpush.bf16.msra.mxu1 %v2659_v62  ;;  %v2752_v21 = vld [vmem:[#allocation3 + $0x270] sm:$0xf0]  ;;  %v3704_v22 = vld [vmem:[#allocation3 + $0x364] sm:$0xf]  ;;  %v2627_v25 = vor.u32 %v3640_v16, %v2624_v19 }
  0x54   :  { %1758 = vmatpush.bf16.msra.mxu2 %v2787_v63  ;;  %v2880_v23 = vld [vmem:[#allocation3 + $0x370] sm:$0xf0]  ;;  %v2755_v26 = vor.u32 %v3672_v20, %v2752_v21  ;;  %v3604_v27 = vld [vmem:[#allocation3 + $0x44] sm:$0xf] }
  0x55   :  { %1772 = vmatpush.bf16.msra.mxu3 %v2915_v4  ;;  %v2480_v28 = vld [vmem:[#allocation3 + $0x50] sm:$0xf0]  ;;  %v3636_v29 = vld [vmem:[#allocation3 + $0x144] sm:$0xf]  ;;  %v2883_v30 = vor.u32 %v3704_v22, %v2880_v23 }
  0x56   :  { %1731 = vmatpush.bf16.msra.mxu0 %v2515_v11  ;;  %v2608_v31 = vld [vmem:[#allocation3 + $0x150] sm:$0xf0]  ;;  %v3668_v32 = vld [vmem:[#allocation3 + $0x244] sm:$0xf]  ;;  %v2483_v36 = vor.u32 %v3604_v27, %v2480_v28 }
  0x57   :  { %1745 = vmatpush.bf16.msra.mxu1 %v2643_v12  ;;  %v2736_v33 = vld [vmem:[#allocation3 + $0x250] sm:$0xf0]  ;;  %v3700_v34 = vld [vmem:[#allocation3 + $0x344] sm:$0xf]  ;;  %v2611_v37 = vor.u32 %v3636_v29, %v2608_v31 }
  0x58   :  { %1759 = vmatpush.bf16.msra.mxu2 %v2771_v13  ;;  %v2864_v35 = vld [vmem:[#allocation3 + $0x350] sm:$0xf0]  ;;  %v2739_v38 = vor.u32 %v3668_v32, %v2736_v33  ;;  %v3600_v40 = vld [vmem:[#allocation3 + $0x24] sm:$0xf] }
  0x59   :  { %1773 = vmatpush.bf16.msra.mxu3 %v2899_v18  ;;  %v2464_v41 = vld [vmem:[#allocation3 + $0x30] sm:$0xf0]  ;;  %v3632_v42 = vld [vmem:[#allocation3 + $0x124] sm:$0xf]  ;;  %v2867_v45 = vor.u32 %v3700_v34, %v2864_v35 }
  0x5a   :  { %1732 = vmatpush.bf16.msra.mxu0 %v2499_v24  ;;  %v2592_v46 = vld [vmem:[#allocation3 + $0x130] sm:$0xf0]  ;;  %v3664_v48 = vld [vmem:[#allocation3 + $0x224] sm:$0xf]  ;;  %v2467_v52 = vor.u32 %v3600_v40, %v2464_v41 }
  0x5b   :  { %1746 = vmatpush.bf16.msra.mxu1 %v2627_v25  ;;  %v2720_v49 = vld [vmem:[#allocation3 + $0x230] sm:$0xf0]  ;;  %v3696_v50 = vld [vmem:[#allocation3 + $0x324] sm:$0xf]  ;;  %v2595_v55 = vor.u32 %v3632_v42, %v2592_v46 }
  0x5c   :  { %1760 = vmatpush.bf16.msra.mxu2 %v2755_v26  ;;  %v2848_v51 = vld [vmem:[#allocation3 + $0x330] sm:$0xf0]  ;;  %v3596_v53 = vld [vmem:[#allocation3 + $0x4] sm:$0xf]  ;;  %v2723_v56 = vor.u32 %v3664_v48, %v2720_v49 }
  0x5d   :  { %1774 = vmatpush.bf16.msra.mxu3 %v2883_v30  ;;  %v2448_v54 = vld [vmem:[#allocation3 + $0x10] sm:$0xf0]  ;;  %v3628_v57 = vld [vmem:[#allocation3 + $0x104] sm:$0xf]  ;;  %v2851_v61 = vor.u32 %v3696_v50, %v2848_v51 }
  0x5e   :  { %1733 = vmatpush.bf16.msra.mxu0 %v2483_v36  ;;  %v2576_v59 = vld [vmem:[#allocation3 + $0x110] sm:$0xf0]  ;;  %v3660_v60 = vld [vmem:[#allocation3 + $0x204] sm:$0xf]  ;;  %v2451_v5 = vor.u32 %v3596_v53, %v2448_v54 }
  0x5f   :  { %1747 = vmatpush.bf16.msra.mxu1 %v2611_v37  ;;  %v2704_v62 = vld [vmem:[#allocation3 + $0x210] sm:$0xf0]  ;;  %v3692_v63 = vld [vmem:[#allocation3 + $0x304] sm:$0xf]  ;;  %v2579_v9 = vor.u32 %v3628_v57, %v2576_v59 }
  0x60   :  { %1761 = vmatpush.bf16.msra.mxu2 %v2739_v38  ;;  %v2832_v0 = vld [vmem:[#allocation3 + $0x310] sm:$0xf0]  ;;  %v3752_v2 = vld [vmem:[#allocation3 + $0x4e4] sm:$0xf]  ;;  %v2707_v11 = vor.u32 %v3660_v60, %v2704_v62 }
  0x61   :  { %1775 = vmatpush.bf16.msra.mxu3 %v2867_v45  ;;  %v3072_v3 = vld [vmem:[#allocation3 + $0x4f0] sm:$0xf0]  ;;  %v3784_v4 = vld [vmem:[#allocation3 + $0x5e4] sm:$0xf]  ;;  %v2835_v14 = vor.u32 %v3692_v63, %v2832_v0 }
  0x62   :  { %1734 = vmatpush.bf16.msra.mxu0 %v2467_v52  ;;  %v3200_v6 = vld [vmem:[#allocation3 + $0x5f0] sm:$0xf0]  ;;  %v3816_v7 = vld [vmem:[#allocation3 + $0x6e4] sm:$0xf]  ;;  %v3075_v15 = vor.u32 %v3752_v2, %v3072_v3 }
  0x63   :  { %v3328_v8 = vld [vmem:[#allocation3 + $0x6f0] sm:$0xf0]  ;;  %1748 = vmatpush.bf16.msra.mxu1 %v2595_v55  ;;  %v3848_v12 = vld [vmem:[#allocation3 + $0x7e4] sm:$0xf]  ;;  %v3203_v16 = vor.u32 %v3784_v4, %v3200_v6 }
  0x64   :  { %1762 = vmatpush.bf16.msra.mxu2 %v2723_v56  ;;  %v3456_v13 = vld [vmem:[#allocation3 + $0x7f0] sm:$0xf0]  ;;  %v3331_v18 = vor.u32 %v3816_v7, %v3328_v8  ;;  %v3748_v19 = vld [vmem:[#allocation3 + $0x4c4] sm:$0xf] }
  0x65   :  { %1776 = vmatpush.bf16.msra.mxu3 %v2851_v61  ;;  %v3056_v20 = vld [vmem:[#allocation3 + $0x4d0] sm:$0xf0]  ;;  %v3780_v21 = vld [vmem:[#allocation3 + $0x5c4] sm:$0xf]  ;;  %v3459_v22 = vor.u32 %v3848_v12, %v3456_v13 }
  0x66   :  { %1735 = vmatpush.bf16.msra.mxu0 %v2451_v5  ;;  %v3184_v23 = vld [vmem:[#allocation3 + $0x5d0] sm:$0xf0]  ;;  %v3812_v24 = vld [vmem:[#allocation3 + $0x6c4] sm:$0xf]  ;;  %v3059_v28 = vor.u32 %v3748_v19, %v3056_v20 }
  0x67   :  { %v3312_v25 = vld [vmem:[#allocation3 + $0x6d0] sm:$0xf0]  ;;  %1749 = vmatpush.bf16.msra.mxu1 %v2579_v9  ;;  %v3844_v26 = vld [vmem:[#allocation3 + $0x7c4] sm:$0xf]  ;;  %v3187_v29 = vor.u32 %v3780_v21, %v3184_v23 }
  0x68   :  { %1763 = vmatpush.bf16.msra.mxu2 %v2707_v11  ;;  %v3440_v27 = vld [vmem:[#allocation3 + $0x7d0] sm:$0xf0]  ;;  %v3315_v30 = vor.u32 %v3812_v24, %v3312_v25  ;;  %v3744_v31 = vld [vmem:[#allocation3 + $0x4a4] sm:$0xf] }
  0x69   :  { %1777 = vmatpush.bf16.msra.mxu3 %v2835_v14  ;;  %v3040_v32 = vld [vmem:[#allocation3 + $0x4b0] sm:$0xf0]  ;;  %v3776_v33 = vld [vmem:[#allocation3 + $0x5a4] sm:$0xf]  ;;  %v3443_v34 = vor.u32 %v3844_v26, %v3440_v27  ;;  %1736 = vmatmul.bf16.vlgmr.msra.gmra.mxu0 %v3959_v58 }
  0x6a   :  { %1784 = vmatpush.bf16.msrb.mxu0 %v3075_v15  ;;  %v3168_v35 = vld [vmem:[#allocation3 + $0x5b0] sm:$0xf0]  ;;  %v3808_v36 = vld [vmem:[#allocation3 + $0x6a4] sm:$0xf]  ;;  %1750 = vmatmul.bf16.vlgmr.msra.gmra.mxu1 %v3977_v10  ;;  %v3043_v41 = vor.u32 %v3744_v31, %v3040_v32 }
  0x6b   :  { %1798 = vmatpush.bf16.msrb.mxu1 %v3203_v16  ;;  %v3296_v37 = vld [vmem:[#allocation3 + $0x6b0] sm:$0xf0]  ;;  %v3840_v38 = vld [vmem:[#allocation3 + $0x7a4] sm:$0xf]  ;;  %1764 = vmatmul.bf16.vlgmr.msra.gmra.mxu2 %v3964_v1  ;;  %v3171_v42 = vor.u32 %v3776_v33, %v3168_v35 }
  0x6c   :  { %1812 = vmatpush.bf16.msrb.mxu2 %v3331_v18  ;;  %v3424_v40 = vld [vmem:[#allocation3 + $0x7b0] sm:$0xf0]  ;;  %1778 = vmatmul.bf16.vlgmr.msra.gmra.mxu3 %v3982_v17  ;;  %v3299_v45 = vor.u32 %v3808_v36, %v3296_v37  ;;  %v3740_v46 = vld [vmem:[#allocation3 + $0x484] sm:$0xf] }
  0x6d   :  { %1826 = vmatpush.bf16.msrb.mxu3 %v3459_v22  ;;  %v3024_v48 = vld [vmem:[#allocation3 + $0x490] sm:$0xf0]  ;;  %v3772_v49 = vld [vmem:[#allocation3 + $0x584] sm:$0xf]  ;;  %v3427_v50 = vor.u32 %v3840_v38, %v3424_v40 }
  0x6e   :  { %1785 = vmatpush.bf16.msrb.mxu0 %v3059_v28  ;;  %v3152_v51 = vld [vmem:[#allocation3 + $0x590] sm:$0xf0]  ;;  %v3804_v52 = vld [vmem:[#allocation3 + $0x684] sm:$0xf]  ;;  %v3027_v56 = vor.u32 %v3740_v46, %v3024_v48  ;;  %v2566_v48 = vld [vmem:[#allocation3 + $0xe8] sm:$0xf] }
  0x6f   :  { %1799 = vmatpush.bf16.msrb.mxu1 %v3187_v29  ;;  %v3280_v53 = vld [vmem:[#allocation3 + $0x690] sm:$0xf0]  ;;  %v3836_v54 = vld [vmem:[#allocation3 + $0x784] sm:$0xf]  ;;  %v3155_v57 = vor.u32 %v3772_v49, %v3152_v51  ;;  %v3627_v49 = vld [vmem:[#allocation3 + $0xf4] sm:$0xf0] }
  0x70   :  { %1813 = vmatpush.bf16.msrb.mxu2 %v3315_v30  ;;  %v3408_v55 = vld [vmem:[#allocation3 + $0x790] sm:$0xf0]  ;;  %v3283_v59 = vor.u32 %v3804_v52, %v3280_v53  ;;  %v3736_v60 = vld [vmem:[#allocation3 + $0x464] sm:$0xf]  ;;  %v3659_v52 = vld [vmem:[#allocation3 + $0x1f4] sm:$0xf0] }
  0x71   :  { %1827 = vmatpush.bf16.msrb.mxu3 %v3443_v34  ;;  %v3008_v61 = vld [vmem:[#allocation3 + $0x470] sm:$0xf0]  ;;  %v3768_v62 = vld [vmem:[#allocation3 + $0x564] sm:$0xf]  ;;  %v3411_v63 = vor.u32 %v3836_v54, %v3408_v55  ;;  %v2822_v53 = vld [vmem:[#allocation3 + $0x2e8] sm:$0xf] }
  0x72   :  { %1786 = vmatpush.bf16.msrb.mxu0 %v3043_v41  ;;  %v3136_v0 = vld [vmem:[#allocation3 + $0x570] sm:$0xf0]  ;;  %v3800_v2 = vld [vmem:[#allocation3 + $0x664] sm:$0xf]  ;;  %v3011_v6 = vor.u32 %v3736_v60, %v3008_v61  ;;  %v3691_v54 = vld [vmem:[#allocation3 + $0x2f4] sm:$0xf0]  ;;  %v2567_v61 = vor.u32 %v3627_v49, %v2566_v48 }
  0x73   :  { %1800 = vmatpush.bf16.msrb.mxu1 %v3171_v42  ;;  %v3264_v3 = vld [vmem:[#allocation3 + $0x670] sm:$0xf0]  ;;  %v3832_v4 = vld [vmem:[#allocation3 + $0x764] sm:$0xf]  ;;  %v3139_v7 = vor.u32 %v3768_v62, %v3136_v0  ;;  %v2550_v0 = vld [vmem:[#allocation3 + $0xc8] sm:$0xf] }
  0x74   :  { %1814 = vmatpush.bf16.msrb.mxu2 %v3299_v45  ;;  %v3392_v5 = vld [vmem:[#allocation3 + $0x770] sm:$0xf0]  ;;  %v3267_v8 = vor.u32 %v3800_v2, %v3264_v3  ;;  %v3732_v9 = vld [vmem:[#allocation3 + $0x444] sm:$0xf]  ;;  %v3623_v2 = vld [vmem:[#allocation3 + $0xd4] sm:$0xf0] }
  0x75   :  { %1828 = vmatpush.bf16.msrb.mxu3 %v3427_v50  ;;  %v2992_v11 = vld [vmem:[#allocation3 + $0x450] sm:$0xf0]  ;;  %v3764_v12 = vld [vmem:[#allocation3 + $0x544] sm:$0xf]  ;;  %v3395_v13 = vor.u32 %v3832_v4, %v3392_v5  ;;  %v2694_v50 = vld [vmem:[#allocation3 + $0x1e8] sm:$0xf] }
  0x76   :  { %1787 = vmatpush.bf16.msrb.mxu0 %v3027_v56  ;;  %v3120_v14 = vld [vmem:[#allocation3 + $0x550] sm:$0xf0]  ;;  %v3796_v15 = vld [vmem:[#allocation3 + $0x644] sm:$0xf]  ;;  %v2995_v20 = vor.u32 %v3732_v9, %v2992_v11  ;;  %v2695_v62 = vor.u32 %v3659_v52, %v2694_v50  ;;  %v2678_v3 = vld [vmem:[#allocation3 + $0x1c8] sm:$0xf]  ;;  %v2551_v11 = vor.u32 %v3623_v2, %v2550_v0 }
  0x77   :  { %1801 = vmatpush.bf16.msrb.mxu1 %v3155_v57  ;;  %v3248_v16 = vld [vmem:[#allocation3 + $0x650] sm:$0xf0]  ;;  %v3828_v18 = vld [vmem:[#allocation3 + $0x744] sm:$0xf]  ;;  %v3123_v21 = vor.u32 %v3764_v12, %v3120_v14  ;;  %v2950_v57 = vld [vmem:[#allocation3 + $0x3e8] sm:$0xf] }
  0x78   :  { %1815 = vmatpush.bf16.msrb.mxu2 %v3283_v59  ;;  %v3376_v19 = vld [vmem:[#allocation3 + $0x750] sm:$0xf0]  ;;  %v3251_v22 = vor.u32 %v3796_v15, %v3248_v16  ;;  %v3728_v23 = vld [vmem:[#allocation3 + $0x424] sm:$0xf]  ;;  %v3723_v59 = vld [vmem:[#allocation3 + $0x3f4] sm:$0xf0] }
  0x79   :  { %1829 = vmatpush.bf16.msrb.mxu3 %v3411_v63  ;;  %v2976_v24 = vld [vmem:[#allocation3 + $0x430] sm:$0xf0]  ;;  %v3760_v25 = vld [vmem:[#allocation3 + $0x524] sm:$0xf]  ;;  %v3379_v26 = vor.u32 %v3828_v18, %v3376_v19  ;;  %v2823_v63 = vor.u32 %v3691_v54, %v2822_v53  ;;  %v2951_v4 = vor.u32 %v3723_v59, %v2950_v57  ;;  %v3655_v5 = vld [vmem:[#allocation3 + $0x1d4] sm:$0xf0] }
  0x7a   :  { %1788 = vmatpush.bf16.msrb.mxu0 %v3011_v6  ;;  %v3104_v27 = vld [vmem:[#allocation3 + $0x530] sm:$0xf0]  ;;  %v3792_v28 = vld [vmem:[#allocation3 + $0x624] sm:$0xf]  ;;  %v2979_v32 = vor.u32 %v3728_v23, %v2976_v24  ;;  %v2806_v6 = vld [vmem:[#allocation3 + $0x2c8] sm:$0xf]  ;;  %v2679_v12 = vor.u32 %v3655_v5, %v2678_v3 }
  0x7b   :  { %1802 = vmatpush.bf16.msrb.mxu1 %v3139_v7  ;;  %v3232_v29 = vld [vmem:[#allocation3 + $0x630] sm:$0xf0]  ;;  %v3824_v30 = vld [vmem:[#allocation3 + $0x724] sm:$0xf]  ;;  %v3107_v35 = vor.u32 %v3760_v25, %v3104_v27  ;;  %v3687_v7 = vld [vmem:[#allocation3 + $0x2d4] sm:$0xf0] }
  0x7c   :  { %1816 = vmatpush.bf16.msrb.mxu2 %v3267_v8  ;;  %v3360_v31 = vld [vmem:[#allocation3 + $0x730] sm:$0xf0]  ;;  %v3724_v33 = vld [vmem:[#allocation3 + $0x404] sm:$0xf]  ;;  %v3235_v36 = vor.u32 %v3792_v28, %v3232_v29  ;;  %v2934_v8 = vld [vmem:[#allocation3 + $0x3c8] sm:$0xf] }
  0x7d   :  { %1830 = vmatpush.bf16.msrb.mxu3 %v3395_v13  ;;  %v2960_v34 = vld [vmem:[#allocation3 + $0x410] sm:$0xf0]  ;;  %v3756_v37 = vld [vmem:[#allocation3 + $0x504] sm:$0xf]  ;;  %v3363_v41 = vor.u32 %v3824_v30, %v3360_v31  ;;  %v3719_v9 = vld [vmem:[#allocation3 + $0x3d4] sm:$0xf0]  ;;  %v2807_v13 = vor.u32 %v3687_v7, %v2806_v6 }
  0x7e   :  { %1789 = vmatpush.bf16.msrb.mxu0 %v2995_v20  ;;  %v3088_v38 = vld [vmem:[#allocation3 + $0x510] sm:$0xf0]  ;;  %v3788_v40 = vld [vmem:[#allocation3 + $0x604] sm:$0xf]  ;;  %v2963_v51 = vor.u32 %v3724_v33, %v2960_v34  ;;  %v2534_v14 = vld [vmem:[#allocation3 + $0xa8] sm:$0xf]  ;;  %v2935_v18 = vor.u32 %v3719_v9, %v2934_v8 }
  0x7f   :  { %1803 = vmatpush.bf16.msrb.mxu1 %v3123_v21  ;;  %v3216_v42 = vld [vmem:[#allocation3 + $0x610] sm:$0xf0]  ;;  %v3820_v45 = vld [vmem:[#allocation3 + $0x704] sm:$0xf]  ;;  %v3091_v55 = vor.u32 %v3756_v37, %v3088_v38  ;;  %v3619_v15 = vld [vmem:[#allocation3 + $0xb4] sm:$0xf0] }
  0x80   :  { %1817 = vmatpush.bf16.msrb.mxu2 %v3251_v22  ;;  %v3344_v46 = vld [vmem:[#allocation3 + $0x710] sm:$0xf0]  ;;  %v3219_v56 = vor.u32 %v3788_v40, %v3216_v42  ;;  %v2662_v16 = vld [vmem:[#allocation3 + $0x1a8] sm:$0xf]  ;;  %v3651_v19 = vld [vmem:[#allocation3 + $0x1b4] sm:$0xf0]  ;;  %v2535_v24 = vor.u32 %v3619_v15, %v2534_v14 }
  0x81   :  { %1831 = vmatpush.bf16.msrb.mxu3 %v3379_v26  ;;  %v3347_v60 = vor.u32 %v3820_v45, %v3344_v46  ;;  %v2790_v20 = vld [vmem:[#allocation3 + $0x2a8] sm:$0xf]  ;;  %v3683_v21 = vld [vmem:[#allocation3 + $0x2b4] sm:$0xf0]  ;;  %v2663_v25 = vor.u32 %v3651_v19, %v2662_v16 }
  0x82   :  { %1790 = vmatpush.bf16.msrb.mxu0 %v2979_v32  ;;  %v2918_v22 = vld [vmem:[#allocation3 + $0x3a8] sm:$0xf]  ;;  %v3715_v23 = vld [vmem:[#allocation3 + $0x3b4] sm:$0xf0]  ;;  %v2791_v26 = vor.u32 %v3683_v21, %v2790_v20 }
  0x83   :  { %1804 = vmatpush.bf16.msrb.mxu1 %v3107_v35  ;;  %v2518_v27 = vld [vmem:[#allocation3 + $0x88] sm:$0xf]  ;;  %v3615_v28 = vld [vmem:[#allocation3 + $0x94] sm:$0xf0]  ;;  %v2919_v30 = vor.u32 %v3715_v23, %v2918_v22 }
  0x84   :  { %1818 = vmatpush.bf16.msrb.mxu2 %v3235_v36  ;;  %v2646_v29 = vld [vmem:[#allocation3 + $0x188] sm:$0xf]  ;;  %v3647_v31 = vld [vmem:[#allocation3 + $0x194] sm:$0xf0]  ;;  %v2519_v36 = vor.u32 %v3615_v28, %v2518_v27 }
  0x85   :  { %1832 = vmatpush.bf16.msrb.mxu3 %v3363_v41  ;;  %v2774_v32 = vld [vmem:[#allocation3 + $0x288] sm:$0xf]  ;;  %v3679_v33 = vld [vmem:[#allocation3 + $0x294] sm:$0xf0]  ;;  %v2647_v37 = vor.u32 %v3647_v31, %v2646_v29 }
  0x86   :  { %1791 = vmatpush.bf16.msrb.mxu0 %v2963_v51  ;;  %v2902_v34 = vld [vmem:[#allocation3 + $0x388] sm:$0xf]  ;;  %v3711_v35 = vld [vmem:[#allocation3 + $0x394] sm:$0xf0]  ;;  %v2775_v38 = vor.u32 %v3679_v33, %v2774_v32 }
  0x87   :  { %1805 = vmatpush.bf16.msrb.mxu1 %v3091_v55  ;;  %v2502_v40 = vld [vmem:[#allocation3 + $0x68] sm:$0xf]  ;;  %v3611_v41 = vld [vmem:[#allocation3 + $0x74] sm:$0xf0]  ;;  %v2903_v45 = vor.u32 %v3711_v35, %v2902_v34 }
  0x88   :  { %1819 = vmatpush.bf16.msrb.mxu2 %v3219_v56  ;;  %v2630_v42 = vld [vmem:[#allocation3 + $0x168] sm:$0xf]  ;;  %v3643_v46 = vld [vmem:[#allocation3 + $0x174] sm:$0xf0]  ;;  %v2503_v52 = vor.u32 %v3611_v41, %v2502_v40 }
  0x89   :  { %1833 = vmatpush.bf16.msrb.mxu3 %v3347_v60  ;;  %1792 = vmatmul.bf16.vlgmr.msrb.gmra.mxu0 %v4010_v39  ;;  %v2758_v48 = vld [vmem:[#allocation3 + $0x268] sm:$0xf]  ;;  %v3675_v49 = vld [vmem:[#allocation3 + $0x274] sm:$0xf0]  ;;  %v2631_v53 = vor.u32 %v3643_v46, %v2630_v42 }
  0x8a   :  { %1840 = vmatpush.bf16.msra.mxu0 %v2567_v61  ;;  %1806 = vmatmul.bf16.vlgmr.msrb.gmra.mxu1 %v4014_v44  ;;  %v2886_v50 = vld [vmem:[#allocation3 + $0x368] sm:$0xf]  ;;  %v3707_v51 = vld [vmem:[#allocation3 + $0x374] sm:$0xf0]  ;;  %v2759_v54 = vor.u32 %v3675_v49, %v2758_v48 }
  0x8b   :  { %1854 = vmatpush.bf16.msra.mxu1 %v2695_v62  ;;  %1820 = vmatmul.bf16.vlgmr.msrb.gmra.mxu2 %v4012_v43  ;;  %v2486_v55 = vld [vmem:[#allocation3 + $0x48] sm:$0xf]  ;;  %v3607_v56 = vld [vmem:[#allocation3 + $0x54] sm:$0xf0]  ;;  %v2887_v59 = vor.u32 %v3707_v51, %v2886_v50 }
  0x8c   :  { %1868 = vmatpush.bf16.msra.mxu2 %v2823_v63  ;;  %1834 = vmatmul.bf16.vlgmr.msrb.gmra.mxu3 %v4016_v47  ;;  %v2614_v57 = vld [vmem:[#allocation3 + $0x148] sm:$0xf]  ;;  %v3639_v60 = vld [vmem:[#allocation3 + $0x154] sm:$0xf0]  ;;  %v2487_v2 = vor.u32 %v3607_v56, %v2486_v55 }
  0x8d   :  { %1882 = vmatpush.bf16.msra.mxu3 %v2951_v4  ;;  %v2742_v61 = vld [vmem:[#allocation3 + $0x248] sm:$0xf]  ;;  %v3671_v62 = vld [vmem:[#allocation3 + $0x254] sm:$0xf0]  ;;  %v2615_v3 = vor.u32 %v3639_v60, %v2614_v57 }
  0x8e   :  { %1841 = vmatpush.bf16.msra.mxu0 %v2551_v11  ;;  %v2870_v63 = vld [vmem:[#allocation3 + $0x348] sm:$0xf]  ;;  %v3703_v0 = vld [vmem:[#allocation3 + $0x354] sm:$0xf0]  ;;  %v2743_v4 = vor.u32 %v3671_v62, %v2742_v61 }
  0x8f   :  { %1855 = vmatpush.bf16.msra.mxu1 %v2679_v12  ;;  %v2470_v5 = vld [vmem:[#allocation3 + $0x28] sm:$0xf]  ;;  %v3603_v6 = vld [vmem:[#allocation3 + $0x34] sm:$0xf0]  ;;  %v2871_v8 = vor.u32 %v3703_v0, %v2870_v63 }
  0x90   :  { %1869 = vmatpush.bf16.msra.mxu2 %v2807_v13  ;;  %v2598_v7 = vld [vmem:[#allocation3 + $0x128] sm:$0xf]  ;;  %v3635_v9 = vld [vmem:[#allocation3 + $0x134] sm:$0xf0]  ;;  %v2471_v15 = vor.u32 %v3603_v6, %v2470_v5 }
  0x91   :  { %1883 = vmatpush.bf16.msra.mxu3 %v2935_v18  ;;  %v2726_v11 = vld [vmem:[#allocation3 + $0x228] sm:$0xf]  ;;  %v3667_v12 = vld [vmem:[#allocation3 + $0x234] sm:$0xf0]  ;;  %v2599_v19 = vor.u32 %v3635_v9, %v2598_v7 }
  0x92   :  { %1842 = vmatpush.bf16.msra.mxu0 %v2535_v24  ;;  %v2854_v13 = vld [vmem:[#allocation3 + $0x328] sm:$0xf]  ;;  %v3699_v14 = vld [vmem:[#allocation3 + $0x334] sm:$0xf0]  ;;  %v2727_v20 = vor.u32 %v3667_v12, %v2726_v11 }
  0x93   :  { %1856 = vmatpush.bf16.msra.mxu1 %v2663_v25  ;;  %v2454_v16 = vld [vmem:[#allocation3 + $0x8] sm:$0xf]  ;;  %v3599_v18 = vld [vmem:[#allocation3 + $0x14] sm:$0xf0]  ;;  %v2855_v24 = vor.u32 %v3699_v14, %v2854_v13 }
  0x94   :  { %1870 = vmatpush.bf16.msra.mxu2 %v2791_v26  ;;  %v2582_v21 = vld [vmem:[#allocation3 + $0x108] sm:$0xf]  ;;  %v3631_v22 = vld [vmem:[#allocation3 + $0x114] sm:$0xf0]  ;;  %v2455_v31 = vor.u32 %v3599_v18, %v2454_v16 }
  0x95   :  { %1884 = vmatpush.bf16.msra.mxu3 %v2919_v30  ;;  %v2710_v23 = vld [vmem:[#allocation3 + $0x208] sm:$0xf]  ;;  %v3663_v25 = vld [vmem:[#allocation3 + $0x214] sm:$0xf0]  ;;  %v2583_v35 = vor.u32 %v3631_v22, %v2582_v21 }
  0x96   :  { %1843 = vmatpush.bf16.msra.mxu0 %v2519_v36  ;;  %v2838_v26 = vld [vmem:[#allocation3 + $0x308] sm:$0xf]  ;;  %v3695_v27 = vld [vmem:[#allocation3 + $0x314] sm:$0xf0]  ;;  %v2711_v36 = vor.u32 %v3663_v25, %v2710_v23 }
  0x97   :  { %1857 = vmatpush.bf16.msra.mxu1 %v2647_v37  ;;  %v3078_v28 = vld [vmem:[#allocation3 + $0x4e8] sm:$0xf]  ;;  %v3755_v29 = vld [vmem:[#allocation3 + $0x4f4] sm:$0xf0]  ;;  %v2839_v40 = vor.u32 %v3695_v27, %v2838_v26 }
  0x98   :  { %1871 = vmatpush.bf16.msra.mxu2 %v2775_v38  ;;  %v3206_v30 = vld [vmem:[#allocation3 + $0x5e8] sm:$0xf]  ;;  %v3787_v32 = vld [vmem:[#allocation3 + $0x5f4] sm:$0xf0]  ;;  %v3079_v41 = vor.u32 %v3755_v29, %v3078_v28 }
  0x99   :  { %1885 = vmatpush.bf16.msra.mxu3 %v2903_v45  ;;  %v3334_v33 = vld [vmem:[#allocation3 + $0x6e8] sm:$0xf]  ;;  %v3819_v34 = vld [vmem:[#allocation3 + $0x6f4] sm:$0xf0]  ;;  %v3207_v42 = vor.u32 %v3787_v32, %v3206_v30 }
  0x9a   :  { %1844 = vmatpush.bf16.msra.mxu0 %v2503_v52  ;;  %v3462_v37 = vld [vmem:[#allocation3 + $0x7e8] sm:$0xf]  ;;  %v3851_v38 = vld [vmem:[#allocation3 + $0x7f4] sm:$0xf0]  ;;  %v3335_v45 = vor.u32 %v3819_v34, %v3334_v33 }
  0x9b   :  { %1858 = vmatpush.bf16.msra.mxu1 %v2631_v53  ;;  %v3062_v46 = vld [vmem:[#allocation3 + $0x4c8] sm:$0xf]  ;;  %v3751_v48 = vld [vmem:[#allocation3 + $0x4d4] sm:$0xf0]  ;;  %v3463_v50 = vor.u32 %v3851_v38, %v3462_v37 }
  0x9c   :  { %1872 = vmatpush.bf16.msra.mxu2 %v2759_v54  ;;  %v3190_v49 = vld [vmem:[#allocation3 + $0x5c8] sm:$0xf]  ;;  %v3783_v51 = vld [vmem:[#allocation3 + $0x5d4] sm:$0xf0]  ;;  %v3063_v56 = vor.u32 %v3751_v48, %v3062_v46 }
  0x9d   :  { %1886 = vmatpush.bf16.msra.mxu3 %v2887_v59  ;;  %v3318_v52 = vld [vmem:[#allocation3 + $0x6c8] sm:$0xf]  ;;  %v3815_v53 = vld [vmem:[#allocation3 + $0x6d4] sm:$0xf0]  ;;  %v3191_v57 = vor.u32 %v3783_v51, %v3190_v49 }
  0x9e   :  { %1845 = vmatpush.bf16.msra.mxu0 %v2487_v2  ;;  %v3446_v54 = vld [vmem:[#allocation3 + $0x7c8] sm:$0xf]  ;;  %v3847_v55 = vld [vmem:[#allocation3 + $0x7d4] sm:$0xf0]  ;;  %v3319_v59 = vor.u32 %v3815_v53, %v3318_v52 }
  0x9f   :  { %1859 = vmatpush.bf16.msra.mxu1 %v2615_v3  ;;  %v3046_v60 = vld [vmem:[#allocation3 + $0x4a8] sm:$0xf]  ;;  %v3747_v61 = vld [vmem:[#allocation3 + $0x4b4] sm:$0xf0]  ;;  %v3447_v63 = vor.u32 %v3847_v55, %v3446_v54 }
  0xa0   :  { %1873 = vmatpush.bf16.msra.mxu2 %v2743_v4  ;;  %v3174_v62 = vld [vmem:[#allocation3 + $0x5a8] sm:$0xf]  ;;  %v3779_v0 = vld [vmem:[#allocation3 + $0x5b4] sm:$0xf0]  ;;  %v3047_v6 = vor.u32 %v3747_v61, %v3046_v60 }
  0xa1   :  { %1887 = vmatpush.bf16.msra.mxu3 %v2871_v8  ;;  %v3302_v2 = vld [vmem:[#allocation3 + $0x6a8] sm:$0xf]  ;;  %v3811_v3 = vld [vmem:[#allocation3 + $0x6b4] sm:$0xf0]  ;;  %v3175_v7 = vor.u32 %v3779_v0, %v3174_v62 }
  0xa2   :  { %1846 = vmatpush.bf16.msra.mxu0 %v2471_v15  ;;  %v3430_v4 = vld [vmem:[#allocation3 + $0x7a8] sm:$0xf]  ;;  %v3843_v5 = vld [vmem:[#allocation3 + $0x7b4] sm:$0xf0]  ;;  %v3303_v8 = vor.u32 %v3811_v3, %v3302_v2 }
  0xa3   :  { %1860 = vmatpush.bf16.msra.mxu1 %v2599_v19  ;;  %v3030_v9 = vld [vmem:[#allocation3 + $0x488] sm:$0xf]  ;;  %v3743_v11 = vld [vmem:[#allocation3 + $0x494] sm:$0xf0]  ;;  %v3431_v13 = vor.u32 %v3843_v5, %v3430_v4 }
  0xa4   :  { %1874 = vmatpush.bf16.msra.mxu2 %v2727_v20  ;;  %v3158_v12 = vld [vmem:[#allocation3 + $0x588] sm:$0xf]  ;;  %v3775_v14 = vld [vmem:[#allocation3 + $0x594] sm:$0xf0]  ;;  %v3031_v20 = vor.u32 %v3743_v11, %v3030_v9  ;;  %v3625_v11 = vld [vmem:[#allocation3 + $0xec] sm:$0xf] }
  0xa5   :  { %1888 = vmatpush.bf16.msra.mxu3 %v2855_v24  ;;  %v3286_v15 = vld [vmem:[#allocation3 + $0x688] sm:$0xf]  ;;  %v3807_v16 = vld [vmem:[#allocation3 + $0x694] sm:$0xf0]  ;;  %v3159_v21 = vor.u32 %v3775_v14, %v3158_v12  ;;  %v2568_v12 = vld [vmem:[#allocation3 + $0xf8] sm:$0xf0] }
  0xa6   :  { %1847 = vmatpush.bf16.msra.mxu0 %v2455_v31  ;;  %v3414_v18 = vld [vmem:[#allocation3 + $0x788] sm:$0xf]  ;;  %v3839_v19 = vld [vmem:[#allocation3 + $0x794] sm:$0xf0]  ;;  %v3287_v22 = vor.u32 %v3807_v16, %v3286_v15  ;;  %v2696_v15 = vld [vmem:[#allocation3 + $0x1f8] sm:$0xf0] }
  0xa7   :  { %1861 = vmatpush.bf16.msra.mxu1 %v2583_v35  ;;  %v3014_v23 = vld [vmem:[#allocation3 + $0x468] sm:$0xf]  ;;  %v3739_v24 = vld [vmem:[#allocation3 + $0x474] sm:$0xf0]  ;;  %v3415_v26 = vor.u32 %v3839_v19, %v3414_v18  ;;  %v3689_v16 = vld [vmem:[#allocation3 + $0x2ec] sm:$0xf] }
  0xa8   :  { %1875 = vmatpush.bf16.msra.mxu2 %v2711_v36  ;;  %v3142_v25 = vld [vmem:[#allocation3 + $0x568] sm:$0xf]  ;;  %v3771_v27 = vld [vmem:[#allocation3 + $0x574] sm:$0xf0]  ;;  %v3015_v32 = vor.u32 %v3739_v24, %v3014_v23  ;;  %v2824_v18 = vld [vmem:[#allocation3 + $0x2f8] sm:$0xf0]  ;;  %v2571_v24 = vor.u32 %v3625_v11, %v2568_v12 }
  0xa9   :  { %1889 = vmatpush.bf16.msra.mxu3 %v2839_v40  ;;  %1848 = vmatmul.bf16.vlgmr.msra.gmra.mxu0 %v3959_v58  ;;  %v3270_v28 = vld [vmem:[#allocation3 + $0x668] sm:$0xf]  ;;  %v3803_v29 = vld [vmem:[#allocation3 + $0x674] sm:$0xf0]  ;;  %v3143_v33 = vor.u32 %v3771_v27, %v3142_v25  ;;  %v3621_v27 = vld [vmem:[#allocation3 + $0xcc] sm:$0xf] }
  0xaa   :  { %1896 = vmatpush.bf16.msrb.mxu0 %v3079_v41  ;;  %1862 = vmatmul.bf16.vlgmr.msra.gmra.mxu1 %v3977_v10  ;;  %v3398_v30 = vld [vmem:[#allocation3 + $0x768] sm:$0xf]  ;;  %v3835_v31 = vld [vmem:[#allocation3 + $0x774] sm:$0xf0]  ;;  %v3271_v34 = vor.u32 %v3803_v29, %v3270_v28  ;;  %v2552_v28 = vld [vmem:[#allocation3 + $0xd8] sm:$0xf0] }
  0xab   :  { %1910 = vmatpush.bf16.msrb.mxu1 %v3207_v42  ;;  %1876 = vmatmul.bf16.vlgmr.msra.gmra.mxu2 %v3964_v1  ;;  %v2998_v35 = vld [vmem:[#allocation3 + $0x448] sm:$0xf]  ;;  %v3735_v36 = vld [vmem:[#allocation3 + $0x454] sm:$0xf0]  ;;  %v3399_v38 = vor.u32 %v3835_v31, %v3398_v30  ;;  %v3653_v29 = vld [vmem:[#allocation3 + $0x1cc] sm:$0xf] }
  0xac   :  { %1924 = vmatpush.bf16.msrb.mxu2 %v3335_v45  ;;  %1890 = vmatmul.bf16.vlgmr.msra.gmra.mxu3 %v3982_v17  ;;  %v3126_v37 = vld [vmem:[#allocation3 + $0x548] sm:$0xf]  ;;  %v3767_v40 = vld [vmem:[#allocation3 + $0x554] sm:$0xf0]  ;;  %v2999_v48 = vor.u32 %v3735_v36, %v2998_v35  ;;  %v2680_v31 = vld [vmem:[#allocation3 + $0x1d8] sm:$0xf0]  ;;  %v2555_v36 = vor.u32 %v3621_v27, %v2552_v28 }
  0xad   :  { %1938 = vmatpush.bf16.msrb.mxu3 %v3463_v50  ;;  %v3254_v41 = vld [vmem:[#allocation3 + $0x648] sm:$0xf]  ;;  %v3799_v42 = vld [vmem:[#allocation3 + $0x654] sm:$0xf0]  ;;  %v3127_v49 = vor.u32 %v3767_v40, %v3126_v37  ;;  %v2936_v35 = vld [vmem:[#allocation3 + $0x3d8] sm:$0xf0]  ;;  %v2683_v37 = vor.u32 %v3653_v29, %v2680_v31 }
  0xae   :  { %1897 = vmatpush.bf16.msrb.mxu0 %v3063_v56  ;;  %v3382_v45 = vld [vmem:[#allocation3 + $0x748] sm:$0xf]  ;;  %v3831_v46 = vld [vmem:[#allocation3 + $0x754] sm:$0xf0]  ;;  %v3255_v50 = vor.u32 %v3799_v42, %v3254_v41  ;;  %v3617_v40 = vld [vmem:[#allocation3 + $0xac] sm:$0xf] }
  0xaf   :  { %1911 = vmatpush.bf16.msrb.mxu1 %v3191_v57  ;;  %v2982_v51 = vld [vmem:[#allocation3 + $0x428] sm:$0xf]  ;;  %v3731_v52 = vld [vmem:[#allocation3 + $0x434] sm:$0xf0]  ;;  %v3383_v54 = vor.u32 %v3831_v46, %v3382_v45  ;;  %v2536_v41 = vld [vmem:[#allocation3 + $0xb8] sm:$0xf0] }
  0xb0   :  { %1925 = vmatpush.bf16.msrb.mxu2 %v3319_v59  ;;  %v3110_v53 = vld [vmem:[#allocation3 + $0x528] sm:$0xf]  ;;  %v3763_v55 = vld [vmem:[#allocation3 + $0x534] sm:$0xf0]  ;;  %v2983_v61 = vor.u32 %v3731_v52, %v2982_v51  ;;  %v3649_v42 = vld [vmem:[#allocation3 + $0x1ac] sm:$0xf]  ;;  %v2539_v52 = vor.u32 %v3617_v40, %v2536_v41 }
  0xb1   :  { %1939 = vmatpush.bf16.msrb.mxu3 %v3447_v63  ;;  %v3238_v56 = vld [vmem:[#allocation3 + $0x628] sm:$0xf]  ;;  %v3795_v57 = vld [vmem:[#allocation3 + $0x634] sm:$0xf0]  ;;  %v3111_v0 = vor.u32 %v3763_v55, %v3110_v53  ;;  %v2664_v46 = vld [vmem:[#allocation3 + $0x1b8] sm:$0xf0] }
  0xb2   :  { %1898 = vmatpush.bf16.msrb.mxu0 %v3047_v6  ;;  %v3366_v59 = vld [vmem:[#allocation3 + $0x728] sm:$0xf]  ;;  %v3827_v60 = vld [vmem:[#allocation3 + $0x734] sm:$0xf0]  ;;  %v3239_v2 = vor.u32 %v3795_v57, %v3238_v56  ;;  %v2920_v51 = vld [vmem:[#allocation3 + $0x3b8] sm:$0xf0]  ;;  %v2667_v53 = vor.u32 %v3649_v42, %v2664_v46 }
  0xb3   :  { %1912 = vmatpush.bf16.msrb.mxu1 %v3175_v7  ;;  %v2966_v62 = vld [vmem:[#allocation3 + $0x408] sm:$0xf]  ;;  %v3727_v63 = vld [vmem:[#allocation3 + $0x414] sm:$0xf0]  ;;  %v3367_v6 = vor.u32 %v3827_v60, %v3366_v59  ;;  %v3613_v55 = vld [vmem:[#allocation3 + $0x8c] sm:$0xf] }
  0xb4   :  { %1926 = vmatpush.bf16.msrb.mxu2 %v3303_v8  ;;  %v3094_v3 = vld [vmem:[#allocation3 + $0x508] sm:$0xf]  ;;  %v3759_v4 = vld [vmem:[#allocation3 + $0x514] sm:$0xf0]  ;;  %v2967_v14 = vor.u32 %v3727_v63, %v2966_v62  ;;  %v2520_v56 = vld [vmem:[#allocation3 + $0x98] sm:$0xf0] }
  0xb5   :  { %1940 = vmatpush.bf16.msrb.mxu3 %v3431_v13  ;;  %v3222_v5 = vld [vmem:[#allocation3 + $0x608] sm:$0xf]  ;;  %v3791_v7 = vld [vmem:[#allocation3 + $0x614] sm:$0xf0]  ;;  %v3657_v13 = vld [vmem:[#allocation3 + $0x1ec] sm:$0xf]  ;;  %v3095_v19 = vor.u32 %v3759_v4, %v3094_v3  ;;  %v4038_v3 = vpop.f32.mrf.mxu0 }
  0xb6   :  { %1899 = vmatpush.bf16.msrb.mxu0 %v3031_v20  ;;  %v3350_v8 = vld [vmem:[#allocation3 + $0x708] sm:$0xf]  ;;  %v3823_v9 = vld [vmem:[#allocation3 + $0x714] sm:$0xf0]  ;;  %v3223_v20 = vor.u32 %v3791_v7, %v3222_v5  ;;  %v2699_v25 = vor.u32 %v3657_v13, %v2696_v15  ;;  %v3645_v57 = vld [vmem:[#allocation3 + $0x18c] sm:$0xf] }
  0xb7   :  { %1913 = vmatpush.bf16.msrb.mxu1 %v3159_v21  ;;  %v3721_v21 = vld [vmem:[#allocation3 + $0x3ec] sm:$0xf]  ;;  %v3351_v23 = vor.u32 %v3823_v9, %v3350_v8  ;;  %v2648_v60 = vld [vmem:[#allocation3 + $0x198] sm:$0xf0]  ;;  %v4040_v9 = vpop.f32.mrf.mxu1 }
  0xb8   :  { %1927 = vmatpush.bf16.msrb.mxu2 %v3287_v22  ;;  %v2952_v22 = vld [vmem:[#allocation3 + $0x3f8] sm:$0xf0]  ;;  %v3709_v63 = vld [vmem:[#allocation3 + $0x38c] sm:$0xf]  ;;  %v2651_v4 = vor.u32 %v3645_v57, %v2648_v60 }
  0xb9   :  { %1941 = vmatpush.bf16.msrb.mxu3 %v3415_v26  ;;  %v2827_v26 = vor.u32 %v3689_v16, %v2824_v18  ;;  %v2955_v30 = vor.u32 %v3721_v21, %v2952_v22  ;;  %v2776_v62 = vld [vmem:[#allocation3 + $0x298] sm:$0xf0]  ;;  %v3641_v8 = vld [vmem:[#allocation3 + $0x16c] sm:$0xf] }
  0xba   :  { %1900 = vmatpush.bf16.msrb.mxu0 %v3015_v32  ;;  %v3685_v32 = vld [vmem:[#allocation3 + $0x2cc] sm:$0xf]  ;;  %v2504_v7 = vld [vmem:[#allocation3 + $0x78] sm:$0xf0] }
  0xbb   :  { %1914 = vmatpush.bf16.msrb.mxu1 %v3143_v33  ;;  %v2808_v33 = vld [vmem:[#allocation3 + $0x2d8] sm:$0xf0]  ;;  %v3673_v13 = vld [vmem:[#allocation3 + $0x26c] sm:$0xf] }
  0xbc   :  { %1928 = vmatpush.bf16.msrb.mxu2 %v3271_v34  ;;  %v3717_v34 = vld [vmem:[#allocation3 + $0x3cc] sm:$0xf]  ;;  %v2632_v12 = vld [vmem:[#allocation3 + $0x178] sm:$0xf0] }
  0xbd   :  { %1942 = vmatpush.bf16.msrb.mxu3 %v3399_v38  ;;  %v2811_v38 = vor.u32 %v3685_v32, %v2808_v33  ;;  %v2939_v45 = vor.u32 %v3717_v34, %v2936_v35  ;;  %v3705_v15 = vld [vmem:[#allocation3 + $0x36c] sm:$0xf]  ;;  %v2888_v16 = vld [vmem:[#allocation3 + $0x378] sm:$0xf0]  ;;  %v4044_v32 = vpop.f32.mrf.mxu3 }
  0xbe   :  { %1901 = vmatpush.bf16.msrb.mxu0 %v2999_v48  ;;  %v3681_v48 = vld [vmem:[#allocation3 + $0x2ac] sm:$0xf]  ;;  %v2488_v22 = vld [vmem:[#allocation3 + $0x58] sm:$0xf0] }
  0xbf   :  { %1915 = vmatpush.bf16.msrb.mxu1 %v3127_v49  ;;  %v2792_v49 = vld [vmem:[#allocation3 + $0x2b8] sm:$0xf0]  ;;  %v3605_v21 = vld [vmem:[#allocation3 + $0x4c] sm:$0xf] }
  0xc0   :  { %1929 = vmatpush.bf16.msrb.mxu2 %v3255_v50  ;;  %v3713_v50 = vld [vmem:[#allocation3 + $0x3ac] sm:$0xf]  ;;  %v2744_v27 = vld [vmem:[#allocation3 + $0x258] sm:$0xf0]  ;;  %v2491_v31 = vor.u32 %v3605_v21, %v2488_v22 }
  0xc1   :  { %1943 = vmatpush.bf16.msrb.mxu3 %v3383_v54  ;;  %v2795_v54 = vor.u32 %v3681_v48, %v2792_v49  ;;  %v2923_v59 = vor.u32 %v3713_v50, %v2920_v51  ;;  %v3701_v28 = vld [vmem:[#allocation3 + $0x34c] sm:$0xf]  ;;  %v2872_v29 = vld [vmem:[#allocation3 + $0x358] sm:$0xf0]  ;;  %v4048_v49 = vpop.f32.mrf.mxu1 }
  0xc2   :  { %1902 = vmatpush.bf16.msrb.mxu0 %v2983_v61  ;;  %v3677_v61 = vld [vmem:[#allocation3 + $0x28c] sm:$0xf]  ;;  %v2600_v40 = vld [vmem:[#allocation3 + $0x138] sm:$0xf0] }
  0xc3   :  { %1916 = vmatpush.bf16.msrb.mxu1 %v3111_v0  ;;  %v2904_v0 = vld [vmem:[#allocation3 + $0x398] sm:$0xf0]  ;;  %v2779_v5 = vor.u32 %v3677_v61, %v2776_v62  ;;  %v3601_v35 = vld [vmem:[#allocation3 + $0x2c] sm:$0xf] }
  0xc4   :  { %1930 = vmatpush.bf16.msrb.mxu2 %v3239_v2  ;;  %v2523_v2 = vor.u32 %v3613_v55, %v2520_v56  ;;  %v2907_v11 = vor.u32 %v3709_v63, %v2904_v0  ;;  %v3665_v41 = vld [vmem:[#allocation3 + $0x22c] sm:$0xf]  ;;  %v2728_v42 = vld [vmem:[#allocation3 + $0x238] sm:$0xf0] }
  0xc5   :  { %1944 = vmatpush.bf16.msrb.mxu3 %v3367_v6  ;;  %v3609_v6 = vld [vmem:[#allocation3 + $0x6c] sm:$0xf]  ;;  %v2856_v48 = vld [vmem:[#allocation3 + $0x338] sm:$0xf0] }
  0xc6   :  { %1903 = vmatpush.bf16.msrb.mxu0 %v2967_v14  ;;  %v2760_v14 = vld [vmem:[#allocation3 + $0x278] sm:$0xf0]  ;;  %v2507_v18 = vor.u32 %v3609_v6, %v2504_v7  ;;  %v3697_v46 = vld [vmem:[#allocation3 + $0x32c] sm:$0xf] }
  0xc7   :  { %1917 = vmatpush.bf16.msrb.mxu1 %v3095_v19  ;;  %v2635_v19 = vor.u32 %v3641_v8, %v2632_v12  ;;  %v3597_v51 = vld [vmem:[#allocation3 + $0xc] sm:$0xf]  ;;  %v2584_v56 = vld [vmem:[#allocation3 + $0x118] sm:$0xf0] }
  0xc8   :  { %1931 = vmatpush.bf16.msrb.mxu2 %v3223_v20  ;;  %v2763_v20 = vor.u32 %v3673_v13, %v2760_v14  ;;  %v3629_v55 = vld [vmem:[#allocation3 + $0x10c] sm:$0xf]  ;;  %v2712_v60 = vld [vmem:[#allocation3 + $0x218] sm:$0xf0] }
  0xc9   :  { %1945 = vmatpush.bf16.msrb.mxu3 %v3351_v23  ;;  %1904 = vmatmul.bf16.vlgmr.msrb.gmra.mxu0 %v4010_v39  ;;  %v3637_v23 = vld [vmem:[#allocation3 + $0x14c] sm:$0xf]  ;;  %v2840_v62 = vld [vmem:[#allocation3 + $0x318] sm:$0xf0]  ;;  %v2587_v8 = vor.u32 %v3629_v55, %v2584_v56 }
  0xca   :  { %1952 = vmatpush.bf16.msra.mxu0 %v2571_v24  ;;  %1918 = vmatmul.bf16.vlgmr.msrb.gmra.mxu1 %v4014_v44  ;;  %v2891_v24 = vor.u32 %v3705_v15, %v2888_v16  ;;  %v3661_v57 = vld [vmem:[#allocation3 + $0x20c] sm:$0xf]  ;;  %v3080_v0 = vld [vmem:[#allocation3 + $0x4f8] sm:$0xf0] }
  0xcb   :  { %1966 = vmatpush.bf16.msra.mxu1 %v2699_v25  ;;  %1932 = vmatmul.bf16.vlgmr.msrb.gmra.mxu2 %v4012_v43  ;;  %v2616_v25 = vld [vmem:[#allocation3 + $0x158] sm:$0xf0]  ;;  %v3693_v61 = vld [vmem:[#allocation3 + $0x30c] sm:$0xf] }
  0xcc   :  { %1980 = vmatpush.bf16.msra.mxu2 %v2827_v26  ;;  %1946 = vmatmul.bf16.vlgmr.msrb.gmra.mxu3 %v4016_v47  ;;  %v3669_v26 = vld [vmem:[#allocation3 + $0x24c] sm:$0xf]  ;;  %v2619_v33 = vor.u32 %v3637_v23, %v2616_v25  ;;  %v3336_v7 = vld [vmem:[#allocation3 + $0x6f8] sm:$0xf0]  ;;  %v2843_v15 = vor.u32 %v3693_v61, %v2840_v62 }
  0xcd   :  { %1994 = vmatpush.bf16.msra.mxu3 %v2955_v30  ;;  %v4042_v30 = vpop.f32.mrf.mxu2  ;;  %v2747_v34 = vor.u32 %v3669_v26, %v2744_v27  ;;  %v3753_v63 = vld [vmem:[#allocation3 + $0x4ec] sm:$0xf]  ;;  %v3464_v13 = vld [vmem:[#allocation3 + $0x7f8] sm:$0xf0] }
  0xce   :  { %1953 = vmatpush.bf16.msra.mxu0 %v2555_v36  ;;  %v2472_v36 = vld [vmem:[#allocation3 + $0x38] sm:$0xf0]  ;;  %v3817_v6 = vld [vmem:[#allocation3 + $0x6ec] sm:$0xf]  ;;  %v3083_v16 = vor.u32 %v3753_v63, %v3080_v0 }
  0xcf   :  { %1967 = vmatpush.bf16.msra.mxu1 %v2683_v37  ;;  %v3633_v37 = vld [vmem:[#allocation3 + $0x12c] sm:$0xf]  ;;  %v2475_v50 = vor.u32 %v3601_v35, %v2472_v36  ;;  %v3064_v22 = vld [vmem:[#allocation3 + $0x4d8] sm:$0xf0] }
  0xd0   :  { %1981 = vmatpush.bf16.msra.mxu2 %v2811_v38  ;;  %v2875_v38 = vor.u32 %v3701_v28, %v2872_v29  ;;  %v3849_v12 = vld [vmem:[#allocation3 + $0x7ec] sm:$0xf]  ;;  %v3192_v25 = vld [vmem:[#allocation3 + $0x5d8] sm:$0xf0] }
  0xd1   :  { %1995 = vmatpush.bf16.msra.mxu3 %v2939_v45  ;;  %v4046_v45 = vpop.f32.mrf.mxu0  ;;  %v3749_v21 = vld [vmem:[#allocation3 + $0x4cc] sm:$0xf]  ;;  %v3320_v27 = vld [vmem:[#allocation3 + $0x6d8] sm:$0xf0] }
  0xd2   :  { %1954 = vmatpush.bf16.msra.mxu0 %v2539_v52  ;;  %v2456_v52 = vld [vmem:[#allocation3 + $0x18] sm:$0xf0]  ;;  %v3781_v23 = vld [vmem:[#allocation3 + $0x5cc] sm:$0xf] }
  0xd3   :  { %1968 = vmatpush.bf16.msra.mxu1 %v2667_v53  ;;  %v2603_v53 = vor.u32 %v3633_v37, %v2600_v40  ;;  %v3813_v26 = vld [vmem:[#allocation3 + $0x6cc] sm:$0xf]  ;;  %v3195_v35 = vor.u32 %v3781_v23, %v3192_v25  ;;  %v3032_v56 = vld [vmem:[#allocation3 + $0x498] sm:$0xf0] }
  0xd4   :  { %1982 = vmatpush.bf16.msra.mxu2 %v2795_v54  ;;  %v2731_v54 = vor.u32 %v3665_v41, %v2728_v42  ;;  %v3845_v29 = vld [vmem:[#allocation3 + $0x7cc] sm:$0xf]  ;;  %v3323_v36 = vor.u32 %v3813_v26, %v3320_v27  ;;  %v3176_v42 = vld [vmem:[#allocation3 + $0x5b8] sm:$0xf0] }
  0xd5   :  { %1996 = vmatpush.bf16.msra.mxu3 %v2923_v59  ;;  %v2859_v59 = vor.u32 %v3697_v46, %v2856_v48  ;;  %v4050_v14 = vpop.f32.mrf.mxu2  ;;  %v3745_v37 = vld [vmem:[#allocation3 + $0x4ac] sm:$0xf]  ;;  %v3304_v48 = vld [vmem:[#allocation3 + $0x6b8] sm:$0xf0] }
  0xd6   :  { %1955 = vmatpush.bf16.msra.mxu0 %v2523_v2  ;;  %v3785_v2 = vld [vmem:[#allocation3 + $0x5ec] sm:$0xf]  ;;  %v3288_v61 = vld [vmem:[#allocation3 + $0x698] sm:$0xf0] }
  0xd7   :  { %1969 = vmatpush.bf16.msra.mxu1 %v2651_v4  ;;  %v2459_v4 = vor.u32 %v3597_v51, %v2456_v52  ;;  %v3777_v40 = vld [vmem:[#allocation3 + $0x5ac] sm:$0xf]  ;;  %v3432_v51 = vld [vmem:[#allocation3 + $0x7b8] sm:$0xf0] }
  0xd8   :  { %1983 = vmatpush.bf16.msra.mxu2 %v2779_v5  ;;  %v3208_v5 = vld [vmem:[#allocation3 + $0x5f8] sm:$0xf0]  ;;  %v3809_v46 = vld [vmem:[#allocation3 + $0x6ac] sm:$0xf] }
  0xd9   :  { %1997 = vmatpush.bf16.msra.mxu3 %v2907_v11  ;;  %v2715_v11 = vor.u32 %v3661_v57, %v2712_v60  ;;  %v4054_v28 = vpop.f32.mrf.mxu0  ;;  %v3741_v55 = vld [vmem:[#allocation3 + $0x48c] sm:$0xf]  ;;  %v3416_v63 = vld [vmem:[#allocation3 + $0x798] sm:$0xf0] }
  0xda   :  { %1956 = vmatpush.bf16.msra.mxu0 %v2507_v18  ;;  %v4052_v18 = vpop.f32.mrf.mxu3  ;;  %v3805_v60 = vld [vmem:[#allocation3 + $0x68c] sm:$0xf]  ;;  %v3128_v27 = vld [vmem:[#allocation3 + $0x558] sm:$0xf0] }
  0xdb   :  { %1970 = vmatpush.bf16.msra.mxu1 %v2635_v19  ;;  %v3211_v19 = vor.u32 %v3785_v2, %v3208_v5  ;;  %v3737_v5 = vld [vmem:[#allocation3 + $0x46c] sm:$0xf] }
  0xdc   :  { %1984 = vmatpush.bf16.msra.mxu2 %v2763_v20  ;;  %v3339_v20 = vor.u32 %v3817_v6, %v3336_v7  ;;  %v3016_v6 = vld [vmem:[#allocation3 + $0x478] sm:$0xf0]  ;;  %v3769_v7 = vld [vmem:[#allocation3 + $0x56c] sm:$0xf] }
  0xdd   :  { %1998 = vmatpush.bf16.msra.mxu3 %v2891_v24  ;;  %v3467_v24 = vor.u32 %v3849_v12, %v3464_v13  ;;  %v4062_v57 = vpop.f32.mrf.mxu2  ;;  %v3144_v12 = vld [vmem:[#allocation3 + $0x578] sm:$0xf0]  ;;  %v3801_v13 = vld [vmem:[#allocation3 + $0x66c] sm:$0xf] }
  0xde   :  { %1957 = vmatpush.bf16.msra.mxu0 %v2491_v31  ;;  %v3448_v31 = vld [vmem:[#allocation3 + $0x7d8] sm:$0xf0]  ;;  %v3733_v23 = vld [vmem:[#allocation3 + $0x44c] sm:$0xf] }
  0xdf   :  { %1971 = vmatpush.bf16.msra.mxu1 %v2619_v33  ;;  %v4056_v33 = vpop.f32.mrf.mxu1  ;;  %v3451_v41 = vor.u32 %v3845_v29, %v3448_v31  ;;  %v3765_v25 = vld [vmem:[#allocation3 + $0x54c] sm:$0xf]  ;;  %v3256_v31 = vld [vmem:[#allocation3 + $0x658] sm:$0xf0] }
  0xe0   :  { %1985 = vmatpush.bf16.msra.mxu2 %v2747_v34  ;;  %v3067_v34 = vor.u32 %v3749_v21, %v3064_v22  ;;  %v3147_v21 = vor.u32 %v3769_v7, %v3144_v12  ;;  %v3797_v29 = vld [vmem:[#allocation3 + $0x64c] sm:$0xf]  ;;  %v3352_v7 = vld [vmem:[#allocation3 + $0x718] sm:$0xf0] }
  0xe1   :  { %1999 = vmatpush.bf16.msra.mxu3 %v2875_v38  ;;  %v3048_v38 = vld [vmem:[#allocation3 + $0x4b8] sm:$0xf0]  ;;  %v4066_v0 = vpop.f32.mrf.mxu0 }
  0xe2   :  { %1958 = vmatpush.bf16.msra.mxu0 %v2475_v50  ;;  %v3841_v50 = vld [vmem:[#allocation3 + $0x7ac] sm:$0xf]  ;;  %v3051_v52 = vor.u32 %v3745_v37, %v3048_v38  ;;  %v4064_v62 = vpop.f32.mrf.mxu3 }
  0xe3   :  { %1972 = vmatpush.bf16.msra.mxu1 %v2603_v53  ;;  %v3179_v53 = vor.u32 %v3777_v40, %v3176_v42  ;;  %v3131_v40 = vor.u32 %v3765_v25, %v3128_v27  ;;  %v3866_v27 = vld [vmem:[%s4211_s3 + $0x70] sm:$0xff] }
  0xe4   :  { %1986 = vmatpush.bf16.msra.mxu2 %v2731_v54  ;;  %v3307_v54 = vor.u32 %v3809_v46, %v3304_v48  ;;  %v3729_v46 = vld [vmem:[#allocation3 + $0x42c] sm:$0xf]  ;;  %v2984_v48 = vld [vmem:[#allocation3 + $0x438] sm:$0xf0] }
  0xe5   :  { %2000 = vmatpush.bf16.msra.mxu3 %v2859_v59  ;;  %v3435_v59 = vor.u32 %v3841_v50, %v3432_v51  ;;  %v3761_v50 = vld [vmem:[#allocation3 + $0x52c] sm:$0xf] }
  0xe6   :  { %1959 = vmatpush.bf16.msra.mxu0 %v2459_v4  ;;  %v3291_v4 = vor.u32 %v3805_v60, %v3288_v61  ;;  %v3725_v61 = vld [vmem:[#allocation3 + $0x40c] sm:$0xf] }
  0xe7   :  { %1973 = vmatpush.bf16.msra.mxu1 %v2587_v8  ;;  %v4068_v8 = vpop.f32.mrf.mxu1 }
  0xe8   :  { %1987 = vmatpush.bf16.msra.mxu2 %v2715_v11 }
  0xe9   :  { %2001 = vmatpush.bf16.msra.mxu3 %v2843_v15  ;;  %1960 = vmatmul.bf16.vlgmr.msra.gmra.mxu0 %v3959_v58  ;;  %v3837_v58 = vld [vmem:[#allocation3 + $0x78c] sm:$0xf]  ;;  %v3272_v15 = vld [vmem:[#allocation3 + $0x678] sm:$0xf0]  ;;  %v1737_v42 = vpop.f32.mrf.mxu0 }
  0xea   :  { %2008 = vmatpush.bf16.msrb.mxu0 %v3083_v16  ;;  %1974 = vmatmul.bf16.vlgmr.msra.gmra.mxu1 %v3977_v10  ;;  %v3035_v10 = vor.u32 %v3741_v55, %v3032_v56  ;;  %v3419_v11 = vor.u32 %v3837_v58, %v3416_v63  ;;  %v3833_v16 = vld [vmem:[#allocation3 + $0x76c] sm:$0xf]  ;;  %v3275_v22 = vor.u32 %v3801_v13, %v3272_v15  ;;  %v4072_v38 = vpop.f32.mrf.mxu3  ;;  %v2968_v58 = vld [vmem:[#allocation3 + $0x418] sm:$0xf0] }
  0xeb   :  { %2022 = vmatpush.bf16.msrb.mxu1 %v3211_v19  ;;  %1988 = vmatmul.bf16.vlgmr.msra.gmra.mxu2 %v3964_v1  ;;  %v3773_v1 = vld [vmem:[#allocation3 + $0x58c] sm:$0xf]  ;;  %v3400_v19 = vld [vmem:[#allocation3 + $0x778] sm:$0xf0]  ;;  %v1640_v13 = vadd.f32 %v4040_v9, %v4038_v3 }
  0xec   :  { %2036 = vmatpush.bf16.msrb.mxu2 %v3339_v20  ;;  %2002 = vmatmul.bf16.vlgmr.msra.gmra.mxu3 %v3982_v17  ;;  %v3160_v17 = vld [vmem:[#allocation3 + $0x598] sm:$0xf0]  ;;  %v3019_v20 = vor.u32 %v3737_v5, %v3016_v6  ;;  %v3403_v26 = vor.u32 %v3833_v16, %v3400_v19  ;;  %v3825_v56 = vld [vmem:[#allocation3 + $0x72c] sm:$0xf] }
  0xed   :  { %2050 = vmatpush.bf16.msrb.mxu3 %v3467_v24  ;;  %v3163_v2 = vor.u32 %v3773_v1, %v3160_v17  ;;  %v3000_v24 = vld [vmem:[#allocation3 + $0x458] sm:$0xf0]  ;;  %v3757_v63 = vld [vmem:[#allocation3 + $0x50c] sm:$0xf]  ;;  %v1654_v25 = vadd.f32 %v4042_v30, %v1640_v13  ;;  %v3852_v13 = vld [vmem:[%s4211_s3] sm:$0xff] }
  0xee   :  { %2009 = vmatpush.bf16.msrb.mxu0 %v3067_v34  ;;  %v3829_v34 = vld [vmem:[#allocation3 + $0x74c] sm:$0xf]  ;;  %v3003_v37 = vor.u32 %v3733_v23, %v3000_v24  ;;  %v3368_v1 = vld [vmem:[#allocation3 + $0x738] sm:$0xf0] }
  0xef   :  { %2023 = vmatpush.bf16.msrb.mxu1 %v3195_v35  ;;  %v3384_v35 = vld [vmem:[#allocation3 + $0x758] sm:$0xf0]  ;;  %v1751_v55 = vpop.f32.mrf.mxu1  ;;  %v3821_v6 = vld [vmem:[#allocation3 + $0x70c] sm:$0xf]  ;;  %v1668_v30 = vadd.f32 %v4044_v32, %v1654_v25 }
  0xf0   :  { %2037 = vmatpush.bf16.msrb.mxu2 %v3323_v36  ;;  %v4070_v36 = vpop.f32.mrf.mxu2  ;;  %v3387_v51 = vor.u32 %v3829_v34, %v3384_v35  ;;  %v3224_v5 = vld [vmem:[#allocation3 + $0x618] sm:$0xf0]  ;;  %v1752_v23 = vadd.f32 %v1751_v55, %v1737_v42  ;;  %v3873_v25 = vld [vmem:[%s4211_s3 + $0xa8] sm:$0xff] }
  0xf1   :  { %2051 = vmatpush.bf16.msrb.mxu3 %v3451_v41  ;;  %v3259_v41 = vor.u32 %v3797_v29, %v3256_v31  ;;  %v1739_v24 = vpop.f32.mrf.mxu0  ;;  %v3867_v3 = vld [vmem:[%s4211_s3 + $0x78] sm:$0xff] }
  0xf2   :  { %2010 = vmatpush.bf16.msrb.mxu0 %v3051_v52  ;;  %v3112_v52 = vld [vmem:[#allocation3 + $0x538] sm:$0xf0]  ;;  %v1779_v19 = vpop.f32.mrf.mxu3 }
  0xf3   :  { %2024 = vmatpush.bf16.msrb.mxu1 %v3179_v53  ;;  %v3793_v53 = vld [vmem:[#allocation3 + $0x62c] sm:$0xf]  ;;  %v3115_v17 = vor.u32 %v3761_v50, %v3112_v52  ;;  %v3875_v55 = vld [vmem:[%s4211_s3 + $0xb8] sm:$0xff] }
  0xf4   :  { %2038 = vmatpush.bf16.msrb.mxu2 %v3307_v54  ;;  %v3240_v54 = vld [vmem:[#allocation3 + $0x638] sm:$0xf0] }
  0xf5   :  { %2052 = vmatpush.bf16.msrb.mxu3 %v3435_v59  ;;  %v2987_v59 = vor.u32 %v3729_v46, %v2984_v48  ;;  %v3243_v60 = vor.u32 %v3793_v53, %v3240_v54 }
  0xf6   :  { %2011 = vmatpush.bf16.msrb.mxu0 %v3035_v10  ;;  %v3371_v10 = vor.u32 %v3825_v56, %v3368_v1  ;;  %v3854_v56 = vld [vmem:[%s4211_s3 + $0x10] sm:$0xff] }
  0xf7   :  { %2025 = vmatpush.bf16.msrb.mxu1 %v3163_v2  ;;  %v3096_v2 = vld [vmem:[#allocation3 + $0x518] sm:$0xf0]  ;;  %v1753_v9 = vpop.f32.mrf.mxu1 }
  0xf8   :  { %2039 = vmatpush.bf16.msrb.mxu2 %v3291_v4  ;;  %v3789_v4 = vld [vmem:[#allocation3 + $0x60c] sm:$0xf]  ;;  %v1765_v12 = vpop.f32.mrf.mxu2  ;;  %v3099_v15 = vor.u32 %v3757_v63, %v3096_v2 }
  0xf9   :  { %2053 = vmatpush.bf16.msrb.mxu3 %v3419_v11  ;;  %v2971_v11 = vor.u32 %v3725_v61, %v2968_v58  ;;  %v3227_v16 = vor.u32 %v3789_v4, %v3224_v5  ;;  %v3853_v63 = vld [vmem:[%s4211_s3 + $0x8] sm:$0xff] }
  0xfa   :  { %2012 = vmatpush.bf16.msrb.mxu0 %v3019_v20  ;;  %v3355_v20 = vor.u32 %v3821_v6, %v3352_v7  ;;  %v1781_v34 = vpop.f32.mrf.mxu3  ;;  %v3861_v5 = vld [vmem:[%s4211_s3 + $0x48] sm:$0xff] }
  0xfb   :  { %2026 = vmatpush.bf16.msrb.mxu1 %v3147_v21  ;;  %v3859_v21 = vld [vmem:[%s4211_s3 + $0x38] sm:$0xff] }
  0xfc   :  { %2040 = vmatpush.bf16.msrb.mxu2 %v3275_v22  ;;  %v1642_v22 = vadd.f32 %v4048_v49, %v4046_v45  ;;  %v1766_v49 = vadd.f32 %v1765_v12, %v1752_v23 }
  0xfd   :  { %2054 = vmatpush.bf16.msrb.mxu3 %v3403_v26  ;;  %v3858_v26 = vld [vmem:[%s4211_s3 + $0x30] sm:$0xff] }
  0xfe   :  { %2013 = vmatpush.bf16.msrb.mxu0 %v3003_v37  ;;  %v1656_v45 = vadd.f32 %v4050_v14, %v1642_v22  ;;  %v3857_v14 = vld [vmem:[%s4211_s3 + $0x28] sm:$0xff]  ;;  %v1780_v31 = vadd.f32 %v1779_v19, %v1766_v49  ;;  %v3856_v37 = vld [vmem:[%s4211_s3 + $0x20] sm:$0xff] }
  0xff   :  { %2027 = vmatpush.bf16.msrb.mxu1 %v3131_v40 }
 0x100   :  { %2041 = vmatpush.bf16.msrb.mxu2 %v3259_v41  ;;  %v1767_v29 = vpop.f32.mrf.mxu2  ;;  %v3864_v41 = vld [vmem:[%s4211_s3 + $0x60] sm:$0xff] }
 0x101   :  { %2055 = vmatpush.bf16.msrb.mxu3 %v3387_v51  ;;  %v3863_v51 = vld [vmem:[%s4211_s3 + $0x58] sm:$0xff] }
 0x102   :  { %2014 = vmatpush.bf16.msrb.mxu0 %v2987_v59 }
 0x103   :  { %2028 = vmatpush.bf16.msrb.mxu1 %v3115_v17  ;;  %v3862_v17 = vld [vmem:[%s4211_s3 + $0x50] sm:$0xff] }
 0x104   :  { %2042 = vmatpush.bf16.msrb.mxu2 %v3243_v60 }
 0x105   :  { %2056 = vmatpush.bf16.msrb.mxu3 %v3371_v10 }
 0x106   :  { %2015 = vmatpush.bf16.msrb.mxu0 %v2971_v11  ;;  %v1793_v35 = vpop.f32.mrf.mxu0 }
 0x107   :  { %2029 = vmatpush.bf16.msrb.mxu1 %v3099_v15  ;;  %v1807_v40 = vpop.f32.mrf.mxu1 }
 0x108   :  { %2043 = vmatpush.bf16.msrb.mxu2 %v3227_v16 }
 0x109   :  { %2057 = vmatpush.bf16.msrb.mxu3 %v3355_v20  ;;  %2016 = vmatmul.bf16.vlgmr.msrb.gmra.mxu0 %v4010_v39  ;;  %v1670_v39 = vadd.f32 %v4052_v18, %v1656_v45  ;;  %v1794_v18 = vadd.f32 %v1793_v35, %v1780_v31  ;;  %v3860_v20 = vld [vmem:[%s4211_s3 + $0x40] sm:$0xff]  ;;  %v3871_v45 = vld [vmem:[%s4211_s3 + $0x98] sm:$0xff] }
 0x10a   :  { %2381 = vmatpush.bf16.msra.mxu0 %v3859_v21  ;;  %2030 = vmatmul.bf16.vlgmr.msrb.gmra.mxu1 %v4014_v44  ;;  %v3865_v44 = vld [vmem:[%s4211_s3 + $0x68] sm:$0xff] }
 0x10b   :  { %2395 = vmatpush.bf16.msra.mxu1 %v3867_v3  ;;  %2044 = vmatmul.bf16.vlgmr.msrb.gmra.mxu2 %v4012_v43  ;;  %v1682_v43 = vadd.f32 %v4054_v28, %v1668_v30  ;;  %v1684_v32 = vadd.f32 %v4066_v0, %v1670_v39  ;;  %v3855_v0 = vld [vmem:[%s4211_s3 + $0x18] sm:$0xff]  ;;  %v1808_v50 = vadd.f32 %v1807_v40, %v1794_v18  ;;  %v3870_v30 = vld [vmem:[%s4211_s3 + $0x90] sm:$0xff] }
 0x10c   :  { %2058 = vmatmul.bf16.vlgmr.msrb.gmra.mxu3 %v4016_v47  ;;  %v1754_v47 = vadd.f32 %v1753_v9, %v1739_v24  ;;  %2409 = vmatpush.bf16.msra.mxu2 %v3875_v55 }
 0x10d   :  { %v1696_v42 = vadd.f32 %v4056_v33, %v1682_v43  ;;  %v1698_v28 = vadd.f32 %v4068_v8, %v1684_v32  ;;  %v3868_v43 = vld [vmem:[%s4211_s3 + $0x80] sm:$0xff] }
 0x10e   :  { %2382 = vmatpush.bf16.msra.mxu0 %v3858_v26  ;;  %v1768_v46 = vadd.f32 %v1767_v29, %v1754_v47  ;;  %v1821_v52 = vpop.f32.mrf.mxu2  ;;  %v1795_v54 = vpop.f32.mrf.mxu0  ;;  %v3872_v26 = vld [vmem:[%s4211_s3 + $0xa0] sm:$0xff]  ;;  %v3869_v29 = vld [vmem:[%s4211_s3 + $0x88] sm:$0xff] }
 0x10f   :  { %2396 = vmatpush.bf16.msra.mxu1 %v3866_v27  ;;  %v1712_v48 = vadd.f32 %v4070_v36, %v1698_v28  ;;  %v1710_v53 = vadd.f32 %v4062_v57, %v1696_v42  ;;  %v1835_v8 = vpop.f32.mrf.mxu3  ;;  %v4128_v36 = vld [vmem:[%s4210_s2] sm:$0xf]  ;;  %v1822_v57 = vadd.f32 %v1821_v52, %v1808_v50  ;;  %v1809_v60 = vpop.f32.mrf.mxu1 }
 0x110   :  { %v1782_v33 = vadd.f32 %v1781_v34, %v1768_v46  ;;  %v2093_v58 = vperm.slane %v4128_v36, 0  ;;  %v2094_v2 = vperm.slane %v4128_v36, 1 }
 0x111   :  { %v1726_v1 = vadd.f32 %v4072_v38, %v1712_v48  ;;  %v1724_v61 = vadd.f32 %v4064_v62, %v1710_v53  ;;  %v1836_v38 = vadd.f32 %v1835_v8, %v1822_v57  ;;  %v3874_v62 = vld [vmem:[%s4211_s3 + $0xb0] sm:$0xff]  ;;  %v2095_v8 = vperm.slane %v4128_v36, 2 }
 0x112   :  { %2383 = vmatpush.bf16.msra.mxu0 %v3857_v14  ;;  %v1796_v59 = vadd.f32 %v1795_v54, %v1782_v33  ;;  %2410 = vmatpush.bf16.msra.mxu2 %v3874_v62 }
 0x113   :  { %2397 = vmatpush.bf16.msra.mxu1 %v3865_v44  ;;  %v2105_v10 = vadd.f32 %v2093_v58, %v1726_v1  ;;  %v2101_v7 = vadd.f32 %v2093_v58, %v1724_v61  ;;  %v2102_v16 = vadd.f32 %v2094_v2, %v1836_v38  ;;  %v3883_v1 = vld [vmem:[%s4211_s3 + $0xf8] sm:$0xff] }
 0x114   :  { %v1810_v4 = vadd.f32 %v1809_v60, %v1796_v59  ;;  %2423 = vmatpush.bf16.msra.mxu3 %v3883_v1 }
 0x115   :  { %v2113_v15 = vmax.f32 %v2105_v10, 0.0  ;;  %v2109_v21 = vmax.f32 %v2101_v7, 0.0  ;;  %v2110_v24 = vmax.f32 %v2102_v16, 0.0 }
 0x116   :  { %2384 = vmatpush.bf16.msra.mxu0 %v3856_v37  ;;  %v1823_v6 = vpop.f32.mrf.mxu2  ;;  %2411 = vmatpush.bf16.msra.mxu2 %v3873_v25 }
 0x117   :  { %2398 = vmatpush.bf16.msra.mxu1 %v3864_v41  ;;  %v1824_v11 = vadd.f32 %v1823_v6, %v1810_v4  ;;  %v1837_v12 = vpop.f32.mrf.mxu3  ;;  %v2117_v23 = vpack.c.bf16 %v2113_v15, %v2109_v21  ;;  %v3880_v4 = vld [vmem:[%s4211_s3 + $0xe0] sm:$0xff]  ;;  %v3878_v6 = vld [vmem:[%s4211_s3 + $0xd0] sm:$0xff] }
 0x118   :  { %v3876_v15 = vld [vmem:[%s4211_s3 + $0xc0] sm:$0xff] }
 0x119   :  { %v1838_v19 = vadd.f32 %v1837_v12, %v1824_v11  ;;  %v3877_v11 = vld [vmem:[%s4211_s3 + $0xc8] sm:$0xff] }
 0x11a   :  { %2385 = vmatpush.bf16.msra.mxu0 %v3855_v0  ;;  %2412 = vmatpush.bf16.msra.mxu2 %v3872_v26 }
 0x11b   :  { %2399 = vmatpush.bf16.msra.mxu1 %v3863_v51  ;;  %v2106_v22 = vadd.f32 %v2094_v2, %v1838_v19  ;;  %v3881_v2 = vld [vmem:[%s4211_s3 + $0xe8] sm:$0xff] }
 0x11d   :  { %v2114_v3 = vmax.f32 %v2106_v22, 0.0 }
 0x11e   :  { %2386 = vmatpush.bf16.msra.mxu0 %v3854_v56  ;;  %2413 = vmatpush.bf16.msra.mxu2 %v3871_v45 }
 0x11f   :  { %2400 = vmatpush.bf16.msra.mxu1 %v3862_v17  ;;  %v2118_v9 = vpack.c.bf16 %v2114_v3, %v2110_v24  ;;  %v3882_v17 = vld [vmem:[%s4211_s3 + $0xf0] sm:$0xff] }
 0x120   :  { %2424 = vmatpush.bf16.msra.mxu3 %v3882_v17 }
 0x122   :  { %2387 = vmatpush.bf16.msra.mxu0 %v3853_v63  ;;  %2414 = vmatpush.bf16.msra.mxu2 %v3870_v30 }
 0x123   :  { %2401 = vmatpush.bf16.msra.mxu1 %v3861_v5  ;;  %v3879_v5 = vld [vmem:[%s4211_s3 + $0xd8] sm:$0xff] }
 0x124   :  { %2425 = vmatpush.bf16.msra.mxu3 %v3881_v2 }
 0x126   :  { %2388 = vmatpush.bf16.msra.mxu0 %v3852_v13  ;;  %v1849_v49 = vpop.f32.mrf.mxu0  ;;  %2415 = vmatpush.bf16.msra.mxu2 %v3869_v29 }
 0x127   :  { %2402 = vmatpush.bf16.msra.mxu1 %v3860_v20  ;;  %v1863_v27 = vpop.f32.mrf.mxu1 }
 0x128   :  { %v1864_v31 = vadd.f32 %v1863_v27, %v1849_v49  ;;  %2426 = vmatpush.bf16.msra.mxu3 %v3880_v4 }
 0x129   :  { %2389 = vmatmul.bf16.vlgmr.msra.gmra.mxu0 %v2117_v23 }
 0x12a   :  { %2403 = vmatmul.bf16.vlgmr.msra.gmra.mxu1 %v2118_v9  ;;  %2416 = vmatpush.bf16.msra.mxu2 %v3868_v43  ;;  %v2096_v43 = vperm.slane %v4128_v36, 3 }
 0x12c   :  { %2427 = vmatpush.bf16.msra.mxu3 %v3879_v5 }
 0x12e   :  { %v1877_v14 = vpop.f32.mrf.mxu2  ;;  %v1851_v34 = vpop.f32.mrf.mxu0 }
 0x12f   :  { %v1891_v39 = vpop.f32.mrf.mxu3  ;;  %v1865_v44 = vpop.f32.mrf.mxu1  ;;  %v1878_v32 = vadd.f32 %v1877_v14, %v1864_v31 }
 0x130   :  { %v1866_v40 = vadd.f32 %v1865_v44, %v1851_v34  ;;  %2428 = vmatpush.bf16.msra.mxu3 %v3878_v6 }
 0x131   :  { %v1892_v35 = vadd.f32 %v1891_v39, %v1878_v32 }
 0x134   :  { %2429 = vmatpush.bf16.msra.mxu3 %v3877_v11 }
 0x136   :  { %v1879_v47 = vpop.f32.mrf.mxu2 }
 0x137   :  { %v1893_v37 = vpop.f32.mrf.mxu3  ;;  %v1880_v28 = vadd.f32 %v1879_v47, %v1866_v40 }
 0x138   :  { %2430 = vmatpush.bf16.msra.mxu3 %v3876_v15 }
 0x139   :  { %v1894_v48 = vadd.f32 %v1893_v37, %v1880_v28 }
 0x146   :  { %v1905_v18 = vpop.f32.mrf.mxu0 }
 0x147   :  { %v1919_v41 = vpop.f32.mrf.mxu1  ;;  %v1906_v42 = vadd.f32 %v1905_v18, %v1892_v35 }
 0x149   :  { %v1920_v46 = vadd.f32 %v1919_v41, %v1906_v42 }
 0x14e   :  { %v1933_v0 = vpop.f32.mrf.mxu2  ;;  %v1907_v50 = vpop.f32.mrf.mxu0 }
 0x14f   :  { %v1947_v51 = vpop.f32.mrf.mxu3  ;;  %v1934_v52 = vadd.f32 %v1933_v0, %v1920_v46  ;;  %v1908_v53 = vadd.f32 %v1907_v50, %v1894_v48  ;;  %v1921_v33 = vpop.f32.mrf.mxu1  ;;  %v3887_v48 = vld [vmem:[%s4212_s4] ss:$0 sm:$0xff] }
 0x151   :  { %v1948_v54 = vadd.f32 %v1947_v51, %v1934_v52  ;;  %v1922_v55 = vadd.f32 %v1921_v33, %v1908_v53 }
 0x153   :  { %v2103_v60 = vadd.f32 %v2095_v8, %v1948_v54 }
 0x155   :  { %v2111_v63 = vmax.f32 %v2103_v60, 0.0 }
 0x156   :  { %v1935_v56 = vpop.f32.mrf.mxu2 }
 0x157   :  { %v1936_v57 = vadd.f32 %v1935_v56, %v1922_v55  ;;  %v1949_v59 = vpop.f32.mrf.mxu3 }
 0x159   :  { %v1950_v61 = vadd.f32 %v1949_v59, %v1936_v57 }
 0x15b   :  { %v2107_v58 = vadd.f32 %v2095_v8, %v1950_v61 }
 0x15d   :  { %v2115_v10 = vmax.f32 %v2107_v58, 0.0 }
 0x15f   :  { %v2119_v38 = vpack.c.bf16 %v2115_v10, %v2111_v63 }
 0x161   :  { %2417 = vmatmul.bf16.vlgmr.msra.gmra.mxu2 %v2119_v38 }
 0x166   :  { %v1961_v62 = vpop.f32.mrf.mxu0 }
 0x167   :  { %v1975_v7 = vpop.f32.mrf.mxu1 }
 0x168   :  { %v1976_v19 = vadd.f32 %v1975_v7, %v1961_v62 }
 0x16e   :  { %v1989_v12 = vpop.f32.mrf.mxu2  ;;  %v1963_v16 = vpop.f32.mrf.mxu0 }
 0x16f   :  { %v2003_v13 = vpop.f32.mrf.mxu3  ;;  %v1977_v20 = vpop.f32.mrf.mxu1  ;;  %v1990_v21 = vadd.f32 %v1989_v12, %v1976_v19 }
 0x170   :  { %v1978_v23 = vadd.f32 %v1977_v20, %v1963_v16 }
 0x171   :  { %v2004_v9 = vadd.f32 %v2003_v13, %v1990_v21 }
 0x176   :  { %v1991_v22 = vpop.f32.mrf.mxu2 }
 0x177   :  { %v2005_v24 = vpop.f32.mrf.mxu3  ;;  %v1992_v26 = vadd.f32 %v1991_v22, %v1978_v23 }
 0x179   :  { %v2006_v27 = vadd.f32 %v2005_v24, %v1992_v26 }
 0x186   :  { %v2017_v3 = vpop.f32.mrf.mxu0 }
 0x187   :  { %v2031_v25 = vpop.f32.mrf.mxu1  ;;  %v2018_v45 = vadd.f32 %v2017_v3, %v2004_v9 }
 0x189   :  { %v2032_v30 = vadd.f32 %v2031_v25, %v2018_v45 }
 0x18e   :  { %v2045_v49 = vpop.f32.mrf.mxu2  ;;  %v2019_v29 = vpop.f32.mrf.mxu0 }
 0x18f   :  { %v2059_v14 = vpop.f32.mrf.mxu3  ;;  %v2046_v39 = vadd.f32 %v2045_v49, %v2032_v30  ;;  %v2020_v31 = vadd.f32 %v2019_v29, %v2006_v27  ;;  %v2033_v34 = vpop.f32.mrf.mxu1 }
 0x191   :  { %v2060_v44 = vadd.f32 %v2059_v14, %v2046_v39  ;;  %v2034_v32 = vadd.f32 %v2033_v34, %v2020_v31 }
 0x193   :  { %v2104_v40 = vadd.f32 %v2096_v43, %v2060_v44 }
 0x195   :  { %v2112_v42 = vmax.f32 %v2104_v40, 0.0 }
 0x196   :  { %v2047_v47 = vpop.f32.mrf.mxu2 }
 0x197   :  { %v2048_v35 = vadd.f32 %v2047_v47, %v2034_v32  ;;  %v2061_v37 = vpop.f32.mrf.mxu3 }
 0x199   :  { %v2062_v18 = vadd.f32 %v2061_v37, %v2048_v35 }
 0x19b   :  { %v2108_v41 = vadd.f32 %v2096_v43, %v2062_v18 }
 0x19d   :  { %v2116_v28 = vmax.f32 %v2108_v41, 0.0 }
 0x19f   :  { %v2120_v46 = vpack.c.bf16 %v2116_v28, %v2112_v42 }
 0x1a1   :  { %2431 = vmatmul.bf16.vlgmr.msra.gmra.mxu3 %v2120_v46 }
 0x1a6   :  { %v2390_v0 = vpop.f32.mrf.mxu0 }
 0x1a7   :  { %v2404_v50 = vpop.f32.mrf.mxu1  ;;  %v2391_v52 = vadd.f32 %v3887_v48, %v2390_v0 }
 0x1a9   :  { %v2405_v36 = vadd.f32 %v2404_v50, %v2391_v52 }
 0x1ae   :  { %v2392_v33 = vpop.f32.mrf.mxu0 }
 0x1af   :  { %v2406_v55 = vpop.f32.mrf.mxu1  ;;  %v2393_v56 = vadd.f32 %v3887_v48, %v2392_v33 }
 0x1b1   :  { %v2407_v57 = vadd.f32 %v2406_v55, %v2393_v56 }
 0x1e4   :  { %v2418_v51 = vpop.f32.mrf.mxu2 }
 0x1e5   :  { %v2419_v53 = vadd.f32 %v2418_v51, %v2405_v36 }
 0x1ec   :  { %v2420_v1 = vpop.f32.mrf.mxu2 }
 0x1ed   :  { %v2421_v59 = vadd.f32 %v2420_v1, %v2407_v57 }
 0x224   :  { %v2432_v54 = vpop.f32.mrf.mxu3 }
 0x225   :  { %v2433_v8 = vadd.f32 %v2432_v54, %v2419_v53 }
 0x227   :  { %2437 = vst [vmem:[%s4213_s5] sm:$0xff] %v2433_v8 }
 0x22c   :  { %v2434_v17 = vpop.f32.mrf.mxu3 }
 0x22d   :  { %v2435_v60 = vadd.f32 %v2434_v17, %v2421_v59 }
 0x22f   :  { %2438 = vst [vmem:[%s4213_s5 + $0x8] sm:$0xff] %v2435_v60 }
 0x230   :  { %2443 = vsyncpa [#allocation4], 1 }

</bundles_post_ra>
